<compile_context>
chip_gen: v6e
topology: v6e:2x2x1
jax: 0.10.0
libtpu: 0.0.40
codegen_flags: <defaults>
</compile_context>

<pallas_src>
import jax
import jax.numpy as jnp
from jax.experimental import pallas as pl
from jax.experimental.pallas import tpu as pltpu

EPS = 1e-5    # nn.BatchNorm2d default eps
KH = KW = 3   # BasicBlock uses 3x3 convs throughout


def _round_up(x, m):
    return (x + m - 1) // m * m


def _pick_nb(n, cap=8):
    """Images per grid step: largest divisor of n that is <= cap."""
    for nb in range(min(n, cap), 0, -1):
        if n % nb == 0:
            return nb
    return 1


def _make_fused_kernel(CB, COUT, H, W, NB):
    """One grid step = NB images through all three Conv->ReLU->BN(->Dropout) layers.

    Flattened-row conv trick: full-width output rows whose last two columns are
    junk (windows wrapping across rows); junk is masked between layers and
    cropped by the wrapper at the end.  With kernel=3, stride=1 and paddings
    (0, 1, 1) every layer shares the same padded extent (H, W) and output
    extent (H-2, W-2), so one (CB, LBUF) scratch serves layers 2 and 3.
    """
    HO, WO = H - 2, W - 2
    HW = H * W
    L_OUT = HO * W                              # valid flattened output length
    L_PAD = _round_up(L_OUT, 128)               # lane-dense compute/store width
    OFF = W + 1                                 # flat offset of (1,1) in padded (H, W)
    WCOL = _round_up(OFF, 128)                  # 128-aligned write-back column
    PBASE = WCOL - OFF                          # column where the padded grid starts
    MAX_TAP = (KH - 1) * W + (KW - 1)           # largest tap offset
    LBUF = _round_up(max(WCOL + L_PAD, PBASE + MAX_TAP + L_PAD), 128)
    HW_PAD = _round_up(max(HW, MAX_TAP + L_PAD), 128)   # padded input width (zeros)

    def kernel(x_ref, w_ref, scale_ref, bias_ref, o_ref, buf_ref):
        # Zero the padded-grid scratch once per grid step.  Every later write
        # into it is masked and fully overwrites the interior, so the zero
        # border/tail invariant holds for all layers and all NB images.
        buf_ref[...] = jnp.zeros_like(buf_ref)

        col = jax.lax.broadcasted_iota(jnp.int32, (COUT, L_PAD), 1)
        valid = jnp.logical_and(col % W < WO, col < L_OUT)   # junk-column mask

        def conv_relu_bn(layer, src, base):
            # 9 accumulating K=CB matmuls -- no materialized im2col.
            acc = jnp.zeros((COUT, L_PAD), jnp.float32)
            for t in range(KH * KW):
                dy, dx = divmod(t, KW)
                off = base + dy * W + dx
                acc = acc + jnp.dot(w_ref[layer, t], src[:, off:off + L_PAD],
                                    preferred_element_type=jnp.float32)
            y = jnp.maximum(acc, 0.0)                        # ReLU
            # BatchNorm2d (inference, folded to scale/shift); Dropout = identity.
            return y * scale_ref[layer] + bias_ref[layer]

        for img in range(NB):
            # --- layer 1 (padding=0): taps straight from the input block ---
            y = conv_relu_bn(0, x_ref[img], 0)
            # --- layers 2 & 3 (padding=1): rebuild zero-padded grid in VMEM ---
            for layer in (1, 2):
                buf_ref[0:COUT, WCOL:WCOL + L_PAD] = jnp.where(valid, y, 0.0)
                y = conv_relu_bn(layer, buf_ref[...], PBASE)
            o_ref[img] = y.astype(o_ref.dtype)   # junk/pad columns cropped by wrapper

    return kernel, L_OUT, L_PAD, HW_PAD, LBUF


def basic_block_forward(params, x_nchw):
    """Inference forward of BasicBlock, NCHW in / NCHW out."""
    N, CIN, H, W = x_nchw.shape
    assert [p["padding"] for p in params] == [0, 1, 1]
    assert all(p["w"].shape[:2] == (KH, KW) for p in params)
    COUT = params[0]["w"].shape[-1]
    assert all(p["w"].shape[-1] == COUT for p in params)

    CB = _round_up(max(CIN, COUT), 8)   # channel rows (sublane aligned)
    NB = _pick_nb(N)                    # images per grid step

    kernel, L_OUT, L_PAD, HW_PAD, LBUF = _make_fused_kernel(CB, COUT, H, W, NB)

    # Fold BatchNorm into scale/shift; pack weights as (layer, tap, COUT, CB)
    # with zero-padded input channels (matches the per-tap accumulate order).
    w_l, s_l, b_l = [], [], []
    for p in params:
        kh, kw, ci, co = p["w"].shape
        w_t = jnp.transpose(p["w"].reshape(kh * kw, ci, co), (0, 2, 1))   # (9, co, ci)
        w_t = jnp.pad(w_t, ((0, 0), (0, 0), (0, CB - ci)))                # (9, co, CB)
        w_l.append(w_t)
        inv_std = 1.0 / jnp.sqrt(p["var"] + EPS)
        s_l.append((p["gamma"] * inv_std).reshape(co, 1))
        b_l.append((p["beta"] - p["mean"] * p["gamma"] * inv_std).reshape(co, 1))
    w_all = jnp.stack(w_l).astype(jnp.float32)    # (3, 9, COUT, CB)
    scale = jnp.stack(s_l).astype(jnp.float32)    # (3, COUT, 1)
    bias = jnp.stack(b_l).astype(jnp.float32)     # (3, COUT, 1)

    # Channel-major, flattened-spatial input; zero-pad channels to CB and the
    # spatial axis so the deepest layer-1 tap slice stays in bounds.
    x_flat = x_nchw.astype(jnp.float32).reshape(N, CIN, H * W)
    x_flat = jnp.pad(x_flat, ((0, 0), (0, CB - CIN), (0, HW_PAD - H * W)))

    out_flat = pl.pallas_call(
        kernel,
        out_shape=jax.ShapeDtypeStruct((N, COUT, L_PAD), jnp.float32),
        grid=(N // NB,),
        in_specs=[
            pl.BlockSpec((NB, CB, HW_PAD), lambda n: (n, 0, 0)),
            pl.BlockSpec((3, KH * KW, COUT, CB), lambda n: (0, 0, 0, 0)),
            pl.BlockSpec((3, COUT, 1), lambda n: (0, 0, 0)),
            pl.BlockSpec((3, COUT, 1), lambda n: (0, 0, 0)),
        ],
        out_specs=pl.BlockSpec((NB, COUT, L_PAD), lambda n: (n, 0, 0)),
        scratch_shapes=[pltpu.VMEM((CB, LBUF), jnp.float32)],
        compiler_params=pltpu.CompilerParams(
            dimension_semantics=("parallel",),
        ),
    )(x_flat, w_all, scale, bias)

    # Drop the padding + junk columns of the flattened-row trick.
    out = out_flat[:, :, :L_OUT].reshape(N, COUT, H - 2, W)[:, :, :, : W - 2]
    return out


def init_basic_block_params(key, in_channels, out_channels, kernel_size=3):
    # BasicBlock defaults: use_dilation=False, use_depth_wise=False, last_layer_stride=1
    layer_specs = [(in_channels, out_channels, 0),    # conv_layer_first: padding=0
                   (out_channels, out_channels, 1),   # conv_layer_2:     padding=1
                   (out_channels, out_channels, 1)]   # conv_layer_last:  padding=1
    params = []
    for ci, co, pad in layer_specs:
        key, kw, kg, kb, km, kv = jax.random.split(key, 6)
        fan_in = ci * kernel_size * kernel_size
        w = jax.random.normal(kw, (kernel_size, kernel_size, ci, co),
                              jnp.float32) / jnp.sqrt(fan_in)
        gamma = 1.0 + 0.1 * jax.random.normal(kg, (co,), jnp.float32)
        beta = 0.1 * jax.random.normal(kb, (co,), jnp.float32)
        mean = 0.1 * jax.random.normal(km, (co,), jnp.float32)
        var = 0.9 + 0.2 * jax.random.uniform(kv, (co,), jnp.float32)
        params.append({"w": w, "gamma": gamma, "beta": beta, "mean": mean,
                       "var": var, "padding": pad})
    return params


def reference_forward(params, x_nchw):
    """Plain-JAX (XLA) reference matching PyTorch inference semantics."""
    x = x_nchw
    for p in params:
        w_oihw = jnp.transpose(p["w"], (3, 2, 0, 1))
        y = jax.lax.conv_general_dilated(
            x, w_oihw, window_strides=(1, 1),
            padding=[(p["padding"], p["padding"])] * 2,
            dimension_numbers=("NCHW", "OIHW", "NCHW"))
        y = jnp.maximum(y, 0.0)
        scale = p["gamma"] / jnp.sqrt(p["var"] + EPS)
        shift = p["beta"] - p["mean"] * scale
        x = y * scale[None, :, None, None] + shift[None, :, None, None]
    return x


if __name__ == "__main__":
    key = jax.random.PRNGKey(0)
    kx, kp = jax.random.split(key)
    # PyTorch-style NCHW input: batch=2, in_channels=4, spatial=16x16
    x = jax.random.normal(kx, (2, 4, 16, 16), jnp.float32)
    params = init_basic_block_params(kp, in_channels=4, out_channels=8)

    out = jax.block_until_ready(basic_block_forward(params, x))
    ref = jax.block_until_ready(reference_forward(params, x))

    assert out.shape == (2, 8, 14, 14), out.shape
    max_err = float(jnp.max(jnp.abs(out - ref)))
    assert max_err < 1e-4, f"mismatch vs reference: {max_err}"
    print("KERNEL_OK")
</pallas_src>

<mosaic_0001>
module attributes {stable_mosaic.version = 11 : i64} {
  func.func @kernel(%arg0: i32, %arg1: memref<2x8x384xf32, #tpu.memory_space<vmem>>, %arg2: memref<3x9x8x8xf32, #tpu.memory_space<vmem>>, %arg3: memref<3x8x1xf32, #tpu.memory_space<vmem>>, %arg4: memref<3x8x1xf32, #tpu.memory_space<vmem>>, %arg5: memref<2x8x256xf32, #tpu.memory_space<vmem>>, %arg6: memref<8x512xf32, #tpu.memory_space<vmem>>) attributes {dimension_semantics = [#tpu.dimension_semantics<parallel>], iteration_bounds = array<i64: 1>, scalar_prefetch = 0 : i64, scratch_operands = 1 : i64, tpu.core_type = #tpu.core_type<tc>, window_params = [{transform_indices = @transform_0, window_bounds = array<i64: 2, 8, 384>}, {pipeline_mode = #tpu.pipeline_mode<synchronous>, transform_indices = @transform_1, window_bounds = array<i64: 3, 9, 8, 8>}, {pipeline_mode = #tpu.pipeline_mode<synchronous>, transform_indices = @transform_2, window_bounds = array<i64: 3, 8, 1>}, {pipeline_mode = #tpu.pipeline_mode<synchronous>, transform_indices = @transform_3, window_bounds = array<i64: 3, 8, 1>}, {transform_indices = @transform_4, window_bounds = array<i64: 2, 8, 256>}]} {
    %cst = arith.constant 0.000000e+00 : f32
    %0 = vector.broadcast %cst : f32 to vector<8x512xf32>
    %c0 = arith.constant 0 : index
    %c0_0 = arith.constant 0 : index
    %1 = vector.load %arg6[%c0, %c0_0] : memref<8x512xf32, #tpu.memory_space<vmem>>, vector<8x512xf32>
    tpu.vector_store %arg6[%c0, %c0_0], %0 {strides = array<i32>} : memref<8x512xf32, #tpu.memory_space<vmem>>, vector<8x512xf32>,
    %2 = tpu.iota {dimensions = array<i32: 1>} : vector<8x256xi32>
    %c16_i32 = arith.constant 16 : i32
    %c0_i32 = arith.constant 0 : i32
    %3 = arith.cmpi eq, %c16_i32, %c0_i32 : i32
    %c1_i32 = arith.constant 1 : i32
    %4 = arith.select %3, %c1_i32, %c16_i32 : i32
    %5 = vector.broadcast %4 : i32 to vector<8x256xi32>
    %6 = arith.remsi %2, %5 : vector<8x256xi32>
    %c0_i32_1 = arith.constant 0 : i32
    %7 = vector.broadcast %c0_i32_1 : i32 to vector<8x256xi32>
    %8 = arith.cmpi ne, %6, %7 : vector<8x256xi32>
    %c0_i32_2 = arith.constant 0 : i32
    %9 = vector.broadcast %c0_i32_2 : i32 to vector<8x256xi32>
    %10 = arith.cmpi slt, %6, %9 : vector<8x256xi32>
    %c0_i32_3 = arith.constant 0 : i32
    %11 = arith.cmpi slt, %4, %c0_i32_3 : i32
    %12 = vector.broadcast %11 : i1 to vector<8x256xi1>
    %13 = vector.broadcast %12 : vector<8x256xi1> to vector<8x256xi1>
    %14 = arith.xori %10, %13 : vector<8x256xi1>
    %15 = arith.andi %14, %8 : vector<8x256xi1>
    %16 = vector.broadcast %4 : i32 to vector<8x256xi32>
    %17 = arith.addi %6, %16 : vector<8x256xi32>
    %18 = arith.select %15, %17, %6 : vector<8x256xi1>, vector<8x256xi32>
    %c14_i32 = arith.constant 14 : i32
    %19 = vector.broadcast %c14_i32 : i32 to vector<8x256xi32>
    %20 = arith.cmpi slt, %18, %19 : vector<8x256xi32>
    %c224_i32 = arith.constant 224 : i32
    %21 = vector.broadcast %c224_i32 : i32 to vector<8x256xi32>
    %22 = arith.cmpi slt, %2, %21 : vector<8x256xi32>
    %23 = arith.andi %20, %22 : vector<8x256xi1>
    %c0_4 = arith.constant 0 : index
    %c0_5 = arith.constant 0 : index
    %c0_6 = arith.constant 0 : index
    %24 = vector.load %arg1[%c0_4, %c0_5, %c0_6] : memref<2x8x384xf32, #tpu.memory_space<vmem>>, vector<1x8x384xf32>
    %25 = vector.shape_cast %24 : vector<1x8x384xf32> to vector<8x384xf32>
    %cst_7 = arith.constant 0.000000e+00 : f32
    %26 = vector.broadcast %cst_7 : f32 to vector<8x256xf32>
    %c0_8 = arith.constant 0 : index
    %c0_9 = arith.constant 0 : index
    %c0_10 = arith.constant 0 : index
    %c0_11 = arith.constant 0 : index
    %27 = vector.load %arg2[%c0_8, %c0_9, %c0_10, %c0_11] : memref<3x9x8x8xf32, #tpu.memory_space<vmem>>, vector<1x1x8x8xf32>
    %28 = vector.shape_cast %27 : vector<1x1x8x8xf32> to vector<8x8xf32>
    %29 = vector.extract_strided_slice %25 {offsets = [0, 0], sizes = [8, 256], strides = [1, 1]} : vector<8x384xf32> to vector<8x256xf32>
    %cst_12 = arith.constant dense<0.000000e+00> : vector<8x256xf32>
    %30 = tpu.matmul %28, %29, %cst_12 {dimension_numbers = #tpu.dot_dimension_numbers<[1], [0], [0], [1], [0, 0, 1, 1], [], []>} : vector<8x8xf32>, vector<8x256xf32>, vector<8x256xf32> -> vector<8x256xf32>
    %31 = arith.addf %26, %30 : vector<8x256xf32>
    %c0_13 = arith.constant 0 : index
    %c1 = arith.constant 1 : index
    %c0_14 = arith.constant 0 : index
    %c0_15 = arith.constant 0 : index
    %32 = vector.load %arg2[%c0_13, %c1, %c0_14, %c0_15] : memref<3x9x8x8xf32, #tpu.memory_space<vmem>>, vector<1x1x8x8xf32>
    %33 = vector.shape_cast %32 : vector<1x1x8x8xf32> to vector<8x8xf32>
    %34 = vector.extract_strided_slice %25 {offsets = [0, 1], sizes = [8, 256], strides = [1, 1]} : vector<8x384xf32> to vector<8x256xf32>
    %cst_16 = arith.constant dense<0.000000e+00> : vector<8x256xf32>
    %35 = tpu.matmul %33, %34, %cst_16 {dimension_numbers = #tpu.dot_dimension_numbers<[1], [0], [0], [1], [0, 0, 1, 1], [], []>} : vector<8x8xf32>, vector<8x256xf32>, vector<8x256xf32> -> vector<8x256xf32>
    %36 = arith.addf %31, %35 : vector<8x256xf32>
    %c0_17 = arith.constant 0 : index
    %c2 = arith.constant 2 : index
    %c0_18 = arith.constant 0 : index
    %c0_19 = arith.constant 0 : index
    %37 = vector.load %arg2[%c0_17, %c2, %c0_18, %c0_19] : memref<3x9x8x8xf32, #tpu.memory_space<vmem>>, vector<1x1x8x8xf32>
    %38 = vector.shape_cast %37 : vector<1x1x8x8xf32> to vector<8x8xf32>
    %39 = vector.extract_strided_slice %25 {offsets = [0, 2], sizes = [8, 256], strides = [1, 1]} : vector<8x384xf32> to vector<8x256xf32>
    %cst_20 = arith.constant dense<0.000000e+00> : vector<8x256xf32>
    %40 = tpu.matmul %38, %39, %cst_20 {dimension_numbers = #tpu.dot_dimension_numbers<[1], [0], [0], [1], [0, 0, 1, 1], [], []>} : vector<8x8xf32>, vector<8x256xf32>, vector<8x256xf32> -> vector<8x256xf32>
    %41 = arith.addf %36, %40 : vector<8x256xf32>
    %c0_21 = arith.constant 0 : index
    %c3 = arith.constant 3 : index
    %c0_22 = arith.constant 0 : index
    %c0_23 = arith.constant 0 : index
    %42 = vector.load %arg2[%c0_21, %c3, %c0_22, %c0_23] : memref<3x9x8x8xf32, #tpu.memory_space<vmem>>, vector<1x1x8x8xf32>
    %43 = vector.shape_cast %42 : vector<1x1x8x8xf32> to vector<8x8xf32>
    %44 = vector.extract_strided_slice %25 {offsets = [0, 16], sizes = [8, 256], strides = [1, 1]} : vector<8x384xf32> to vector<8x256xf32>
    %cst_24 = arith.constant dense<0.000000e+00> : vector<8x256xf32>
    %45 = tpu.matmul %43, %44, %cst_24 {dimension_numbers = #tpu.dot_dimension_numbers<[1], [0], [0], [1], [0, 0, 1, 1], [], []>} : vector<8x8xf32>, vector<8x256xf32>, vector<8x256xf32> -> vector<8x256xf32>
    %46 = arith.addf %41, %45 : vector<8x256xf32>
    %c0_25 = arith.constant 0 : index
    %c4 = arith.constant 4 : index
    %c0_26 = arith.constant 0 : index
    %c0_27 = arith.constant 0 : index
    %47 = vector.load %arg2[%c0_25, %c4, %c0_26, %c0_27] : memref<3x9x8x8xf32, #tpu.memory_space<vmem>>, vector<1x1x8x8xf32>
    %48 = vector.shape_cast %47 : vector<1x1x8x8xf32> to vector<8x8xf32>
    %49 = vector.extract_strided_slice %25 {offsets = [0, 17], sizes = [8, 256], strides = [1, 1]} : vector<8x384xf32> to vector<8x256xf32>
    %cst_28 = arith.constant dense<0.000000e+00> : vector<8x256xf32>
    %50 = tpu.matmul %48, %49, %cst_28 {dimension_numbers = #tpu.dot_dimension_numbers<[1], [0], [0], [1], [0, 0, 1, 1], [], []>} : vector<8x8xf32>, vector<8x256xf32>, vector<8x256xf32> -> vector<8x256xf32>
    %51 = arith.addf %46, %50 : vector<8x256xf32>
    %c0_29 = arith.constant 0 : index
    %c5 = arith.constant 5 : index
    %c0_30 = arith.constant 0 : index
    %c0_31 = arith.constant 0 : index
    %52 = vector.load %arg2[%c0_29, %c5, %c0_30, %c0_31] : memref<3x9x8x8xf32, #tpu.memory_space<vmem>>, vector<1x1x8x8xf32>
    %53 = vector.shape_cast %52 : vector<1x1x8x8xf32> to vector<8x8xf32>
    %54 = vector.extract_strided_slice %25 {offsets = [0, 18], sizes = [8, 256], strides = [1, 1]} : vector<8x384xf32> to vector<8x256xf32>
    %cst_32 = arith.constant dense<0.000000e+00> : vector<8x256xf32>
    %55 = tpu.matmul %53, %54, %cst_32 {dimension_numbers = #tpu.dot_dimension_numbers<[1], [0], [0], [1], [0, 0, 1, 1], [], []>} : vector<8x8xf32>, vector<8x256xf32>, vector<8x256xf32> -> vector<8x256xf32>
    %56 = arith.addf %51, %55 : vector<8x256xf32>
    %c0_33 = arith.constant 0 : index
    %c6 = arith.constant 6 : index
    %c0_34 = arith.constant 0 : index
    %c0_35 = arith.constant 0 : index
    %57 = vector.load %arg2[%c0_33, %c6, %c0_34, %c0_35] : memref<3x9x8x8xf32, #tpu.memory_space<vmem>>, vector<1x1x8x8xf32>
    %58 = vector.shape_cast %57 : vector<1x1x8x8xf32> to vector<8x8xf32>
    %59 = vector.extract_strided_slice %25 {offsets = [0, 32], sizes = [8, 256], strides = [1, 1]} : vector<8x384xf32> to vector<8x256xf32>
    %cst_36 = arith.constant dense<0.000000e+00> : vector<8x256xf32>
    %60 = tpu.matmul %58, %59, %cst_36 {dimension_numbers = #tpu.dot_dimension_numbers<[1], [0], [0], [1], [0, 0, 1, 1], [], []>} : vector<8x8xf32>, vector<8x256xf32>, vector<8x256xf32> -> vector<8x256xf32>
    %61 = arith.addf %56, %60 : vector<8x256xf32>
    %c0_37 = arith.constant 0 : index
    %c7 = arith.constant 7 : index
    %c0_38 = arith.constant 0 : index
    %c0_39 = arith.constant 0 : index
    %62 = vector.load %arg2[%c0_37, %c7, %c0_38, %c0_39] : memref<3x9x8x8xf32, #tpu.memory_space<vmem>>, vector<1x1x8x8xf32>
    %63 = vector.shape_cast %62 : vector<1x1x8x8xf32> to vector<8x8xf32>
    %64 = vector.extract_strided_slice %25 {offsets = [0, 33], sizes = [8, 256], strides = [1, 1]} : vector<8x384xf32> to vector<8x256xf32>
    %cst_40 = arith.constant dense<0.000000e+00> : vector<8x256xf32>
    %65 = tpu.matmul %63, %64, %cst_40 {dimension_numbers = #tpu.dot_dimension_numbers<[1], [0], [0], [1], [0, 0, 1, 1], [], []>} : vector<8x8xf32>, vector<8x256xf32>, vector<8x256xf32> -> vector<8x256xf32>
    %66 = arith.addf %61, %65 : vector<8x256xf32>
    %c0_41 = arith.constant 0 : index
    %c8 = arith.constant 8 : index
    %c0_42 = arith.constant 0 : index
    %c0_43 = arith.constant 0 : index
    %67 = vector.load %arg2[%c0_41, %c8, %c0_42, %c0_43] : memref<3x9x8x8xf32, #tpu.memory_space<vmem>>, vector<1x1x8x8xf32>
    %68 = vector.shape_cast %67 : vector<1x1x8x8xf32> to vector<8x8xf32>
    %69 = vector.extract_strided_slice %25 {offsets = [0, 34], sizes = [8, 256], strides = [1, 1]} : vector<8x384xf32> to vector<8x256xf32>
    %cst_44 = arith.constant dense<0.000000e+00> : vector<8x256xf32>
    %70 = tpu.matmul %68, %69, %cst_44 {dimension_numbers = #tpu.dot_dimension_numbers<[1], [0], [0], [1], [0, 0, 1, 1], [], []>} : vector<8x8xf32>, vector<8x256xf32>, vector<8x256xf32> -> vector<8x256xf32>
    %71 = arith.addf %66, %70 : vector<8x256xf32>
    %cst_45 = arith.constant 0.000000e+00 : f32
    %72 = vector.broadcast %cst_45 : f32 to vector<8x256xf32>
    %73 = arith.maximumf %71, %72 : vector<8x256xf32>
    %c0_46 = arith.constant 0 : index
    %c0_47 = arith.constant 0 : index
    %c0_48 = arith.constant 0 : index
    %74 = vector.load %arg3[%c0_46, %c0_47, %c0_48] : memref<3x8x1xf32, #tpu.memory_space<vmem>>, vector<1x8x1xf32>
    %75 = vector.shape_cast %74 : vector<1x8x1xf32> to vector<8x1xf32>
    %76 = vector.broadcast %75 : vector<8x1xf32> to vector<8x256xf32>
    %77 = arith.mulf %73, %76 : vector<8x256xf32>
    %c0_49 = arith.constant 0 : index
    %c0_50 = arith.constant 0 : index
    %c0_51 = arith.constant 0 : index
    %78 = vector.load %arg4[%c0_49, %c0_50, %c0_51] : memref<3x8x1xf32, #tpu.memory_space<vmem>>, vector<1x8x1xf32>
    %79 = vector.shape_cast %78 : vector<1x8x1xf32> to vector<8x1xf32>
    %80 = vector.broadcast %79 : vector<8x1xf32> to vector<8x256xf32>
    %81 = arith.addf %77, %80 : vector<8x256xf32>
    %cst_52 = arith.constant 0.000000e+00 : f32
    %82 = vector.broadcast %cst_52 : f32 to vector<8x256xf32>
    %83 = arith.select %23, %81, %82 : vector<8x256xi1>, vector<8x256xf32>
    %c0_53 = arith.constant 0 : index
    %c128 = arith.constant 128 : index
    %84 = vector.load %arg6[%c0_53, %c128] : memref<8x512xf32, #tpu.memory_space<vmem>>, vector<8x256xf32>
    tpu.vector_store %arg6[%c0_53, %c128], %83 {strides = array<i32>} : memref<8x512xf32, #tpu.memory_space<vmem>>, vector<8x256xf32>,
    %c0_54 = arith.constant 0 : index
    %c0_55 = arith.constant 0 : index
    %85 = vector.load %arg6[%c0_54, %c0_55] : memref<8x512xf32, #tpu.memory_space<vmem>>, vector<8x512xf32>
    %cst_56 = arith.constant 0.000000e+00 : f32
    %86 = vector.broadcast %cst_56 : f32 to vector<8x256xf32>
    %c1_57 = arith.constant 1 : index
    %c0_58 = arith.constant 0 : index
    %c0_59 = arith.constant 0 : index
    %c0_60 = arith.constant 0 : index
    %87 = vector.load %arg2[%c1_57, %c0_58, %c0_59, %c0_60] : memref<3x9x8x8xf32, #tpu.memory_space<vmem>>, vector<1x1x8x8xf32>
    %88 = vector.shape_cast %87 : vector<1x1x8x8xf32> to vector<8x8xf32>
    %89 = vector.extract_strided_slice %85 {offsets = [0, 111], sizes = [8, 256], strides = [1, 1]} : vector<8x512xf32> to vector<8x256xf32>
    %cst_61 = arith.constant dense<0.000000e+00> : vector<8x256xf32>
    %90 = tpu.matmul %88, %89, %cst_61 {dimension_numbers = #tpu.dot_dimension_numbers<[1], [0], [0], [1], [0, 0, 1, 1], [], []>} : vector<8x8xf32>, vector<8x256xf32>, vector<8x256xf32> -> vector<8x256xf32>
    %91 = arith.addf %86, %90 : vector<8x256xf32>
    %c1_62 = arith.constant 1 : index
    %c1_63 = arith.constant 1 : index
    %c0_64 = arith.constant 0 : index
    %c0_65 = arith.constant 0 : index
    %92 = vector.load %arg2[%c1_62, %c1_63, %c0_64, %c0_65] : memref<3x9x8x8xf32, #tpu.memory_space<vmem>>, vector<1x1x8x8xf32>
    %93 = vector.shape_cast %92 : vector<1x1x8x8xf32> to vector<8x8xf32>
    %94 = vector.extract_strided_slice %85 {offsets = [0, 112], sizes = [8, 256], strides = [1, 1]} : vector<8x512xf32> to vector<8x256xf32>
    %cst_66 = arith.constant dense<0.000000e+00> : vector<8x256xf32>
    %95 = tpu.matmul %93, %94, %cst_66 {dimension_numbers = #tpu.dot_dimension_numbers<[1], [0], [0], [1], [0, 0, 1, 1], [], []>} : vector<8x8xf32>, vector<8x256xf32>, vector<8x256xf32> -> vector<8x256xf32>
    %96 = arith.addf %91, %95 : vector<8x256xf32>
    %c1_67 = arith.constant 1 : index
    %c2_68 = arith.constant 2 : index
    %c0_69 = arith.constant 0 : index
    %c0_70 = arith.constant 0 : index
    %97 = vector.load %arg2[%c1_67, %c2_68, %c0_69, %c0_70] : memref<3x9x8x8xf32, #tpu.memory_space<vmem>>, vector<1x1x8x8xf32>
    %98 = vector.shape_cast %97 : vector<1x1x8x8xf32> to vector<8x8xf32>
    %99 = vector.extract_strided_slice %85 {offsets = [0, 113], sizes = [8, 256], strides = [1, 1]} : vector<8x512xf32> to vector<8x256xf32>
    %cst_71 = arith.constant dense<0.000000e+00> : vector<8x256xf32>
    %100 = tpu.matmul %98, %99, %cst_71 {dimension_numbers = #tpu.dot_dimension_numbers<[1], [0], [0], [1], [0, 0, 1, 1], [], []>} : vector<8x8xf32>, vector<8x256xf32>, vector<8x256xf32> -> vector<8x256xf32>
    %101 = arith.addf %96, %100 : vector<8x256xf32>
    %c1_72 = arith.constant 1 : index
    %c3_73 = arith.constant 3 : index
    %c0_74 = arith.constant 0 : index
    %c0_75 = arith.constant 0 : index
    %102 = vector.load %arg2[%c1_72, %c3_73, %c0_74, %c0_75] : memref<3x9x8x8xf32, #tpu.memory_space<vmem>>, vector<1x1x8x8xf32>
    %103 = vector.shape_cast %102 : vector<1x1x8x8xf32> to vector<8x8xf32>
    %104 = vector.extract_strided_slice %85 {offsets = [0, 127], sizes = [8, 256], strides = [1, 1]} : vector<8x512xf32> to vector<8x256xf32>
    %cst_76 = arith.constant dense<0.000000e+00> : vector<8x256xf32>
    %105 = tpu.matmul %103, %104, %cst_76 {dimension_numbers = #tpu.dot_dimension_numbers<[1], [0], [0], [1], [0, 0, 1, 1], [], []>} : vector<8x8xf32>, vector<8x256xf32>, vector<8x256xf32> -> vector<8x256xf32>
    %106 = arith.addf %101, %105 : vector<8x256xf32>
    %c1_77 = arith.constant 1 : index
    %c4_78 = arith.constant 4 : index
    %c0_79 = arith.constant 0 : index
    %c0_80 = arith.constant 0 : index
    %107 = vector.load %arg2[%c1_77, %c4_78, %c0_79, %c0_80] : memref<3x9x8x8xf32, #tpu.memory_space<vmem>>, vector<1x1x8x8xf32>
    %108 = vector.shape_cast %107 : vector<1x1x8x8xf32> to vector<8x8xf32>
    %109 = vector.extract_strided_slice %85 {offsets = [0, 128], sizes = [8, 256], strides = [1, 1]} : vector<8x512xf32> to vector<8x256xf32>
    %cst_81 = arith.constant dense<0.000000e+00> : vector<8x256xf32>
    %110 = tpu.matmul %108, %109, %cst_81 {dimension_numbers = #tpu.dot_dimension_numbers<[1], [0], [0], [1], [0, 0, 1, 1], [], []>} : vector<8x8xf32>, vector<8x256xf32>, vector<8x256xf32> -> vector<8x256xf32>
    %111 = arith.addf %106, %110 : vector<8x256xf32>
    %c1_82 = arith.constant 1 : index
    %c5_83 = arith.constant 5 : index
    %c0_84 = arith.constant 0 : index
    %c0_85 = arith.constant 0 : index
    %112 = vector.load %arg2[%c1_82, %c5_83, %c0_84, %c0_85] : memref<3x9x8x8xf32, #tpu.memory_space<vmem>>, vector<1x1x8x8xf32>
    %113 = vector.shape_cast %112 : vector<1x1x8x8xf32> to vector<8x8xf32>
    %114 = vector.extract_strided_slice %85 {offsets = [0, 129], sizes = [8, 256], strides = [1, 1]} : vector<8x512xf32> to vector<8x256xf32>
    %cst_86 = arith.constant dense<0.000000e+00> : vector<8x256xf32>
    %115 = tpu.matmul %113, %114, %cst_86 {dimension_numbers = #tpu.dot_dimension_numbers<[1], [0], [0], [1], [0, 0, 1, 1], [], []>} : vector<8x8xf32>, vector<8x256xf32>, vector<8x256xf32> -> vector<8x256xf32>
    %116 = arith.addf %111, %115 : vector<8x256xf32>
    %c1_87 = arith.constant 1 : index
    %c6_88 = arith.constant 6 : index
    %c0_89 = arith.constant 0 : index
    %c0_90 = arith.constant 0 : index
    %117 = vector.load %arg2[%c1_87, %c6_88, %c0_89, %c0_90] : memref<3x9x8x8xf32, #tpu.memory_space<vmem>>, vector<1x1x8x8xf32>
    %118 = vector.shape_cast %117 : vector<1x1x8x8xf32> to vector<8x8xf32>
    %119 = vector.extract_strided_slice %85 {offsets = [0, 143], sizes = [8, 256], strides = [1, 1]} : vector<8x512xf32> to vector<8x256xf32>
    %cst_91 = arith.constant dense<0.000000e+00> : vector<8x256xf32>
    %120 = tpu.matmul %118, %119, %cst_91 {dimension_numbers = #tpu.dot_dimension_numbers<[1], [0], [0], [1], [0, 0, 1, 1], [], []>} : vector<8x8xf32>, vector<8x256xf32>, vector<8x256xf32> -> vector<8x256xf32>
    %121 = arith.addf %116, %120 : vector<8x256xf32>
    %c1_92 = arith.constant 1 : index
    %c7_93 = arith.constant 7 : index
    %c0_94 = arith.constant 0 : index
    %c0_95 = arith.constant 0 : index
    %122 = vector.load %arg2[%c1_92, %c7_93, %c0_94, %c0_95] : memref<3x9x8x8xf32, #tpu.memory_space<vmem>>, vector<1x1x8x8xf32>
    %123 = vector.shape_cast %122 : vector<1x1x8x8xf32> to vector<8x8xf32>
    %124 = vector.extract_strided_slice %85 {offsets = [0, 144], sizes = [8, 256], strides = [1, 1]} : vector<8x512xf32> to vector<8x256xf32>
    %cst_96 = arith.constant dense<0.000000e+00> : vector<8x256xf32>
    %125 = tpu.matmul %123, %124, %cst_96 {dimension_numbers = #tpu.dot_dimension_numbers<[1], [0], [0], [1], [0, 0, 1, 1], [], []>} : vector<8x8xf32>, vector<8x256xf32>, vector<8x256xf32> -> vector<8x256xf32>
    %126 = arith.addf %121, %125 : vector<8x256xf32>
    %c1_97 = arith.constant 1 : index
    %c8_98 = arith.constant 8 : index
    %c0_99 = arith.constant 0 : index
    %c0_100 = arith.constant 0 : index
    %127 = vector.load %arg2[%c1_97, %c8_98, %c0_99, %c0_100] : memref<3x9x8x8xf32, #tpu.memory_space<vmem>>, vector<1x1x8x8xf32>
    %128 = vector.shape_cast %127 : vector<1x1x8x8xf32> to vector<8x8xf32>
    %129 = vector.extract_strided_slice %85 {offsets = [0, 145], sizes = [8, 256], strides = [1, 1]} : vector<8x512xf32> to vector<8x256xf32>
    %cst_101 = arith.constant dense<0.000000e+00> : vector<8x256xf32>
    %130 = tpu.matmul %128, %129, %cst_101 {dimension_numbers = #tpu.dot_dimension_numbers<[1], [0], [0], [1], [0, 0, 1, 1], [], []>} : vector<8x8xf32>, vector<8x256xf32>, vector<8x256xf32> -> vector<8x256xf32>
    %131 = arith.addf %126, %130 : vector<8x256xf32>
    %cst_102 = arith.constant 0.000000e+00 : f32
    %132 = vector.broadcast %cst_102 : f32 to vector<8x256xf32>
    %133 = arith.maximumf %131, %132 : vector<8x256xf32>
    %c1_103 = arith.constant 1 : index
    %c0_104 = arith.constant 0 : index
    %c0_105 = arith.constant 0 : index
    %134 = vector.load %arg3[%c1_103, %c0_104, %c0_105] : memref<3x8x1xf32, #tpu.memory_space<vmem>>, vector<1x8x1xf32>
    %135 = vector.shape_cast %134 : vector<1x8x1xf32> to vector<8x1xf32>
    %136 = vector.broadcast %135 : vector<8x1xf32> to vector<8x256xf32>
    %137 = arith.mulf %133, %136 : vector<8x256xf32>
    %c1_106 = arith.constant 1 : index
    %c0_107 = arith.constant 0 : index
    %c0_108 = arith.constant 0 : index
    %138 = vector.load %arg4[%c1_106, %c0_107, %c0_108] : memref<3x8x1xf32, #tpu.memory_space<vmem>>, vector<1x8x1xf32>
    %139 = vector.shape_cast %138 : vector<1x8x1xf32> to vector<8x1xf32>
    %140 = vector.broadcast %139 : vector<8x1xf32> to vector<8x256xf32>
    %141 = arith.addf %137, %140 : vector<8x256xf32>
    %cst_109 = arith.constant 0.000000e+00 : f32
    %142 = vector.broadcast %cst_109 : f32 to vector<8x256xf32>
    %143 = arith.select %23, %141, %142 : vector<8x256xi1>, vector<8x256xf32>
    %c0_110 = arith.constant 0 : index
    %c128_111 = arith.constant 128 : index
    %144 = vector.load %arg6[%c0_110, %c128_111] : memref<8x512xf32, #tpu.memory_space<vmem>>, vector<8x256xf32>
    tpu.vector_store %arg6[%c0_110, %c128_111], %143 {strides = array<i32>} : memref<8x512xf32, #tpu.memory_space<vmem>>, vector<8x256xf32>,
    %c0_112 = arith.constant 0 : index
    %c0_113 = arith.constant 0 : index
    %145 = vector.load %arg6[%c0_112, %c0_113] : memref<8x512xf32, #tpu.memory_space<vmem>>, vector<8x512xf32>
    %cst_114 = arith.constant 0.000000e+00 : f32
    %146 = vector.broadcast %cst_114 : f32 to vector<8x256xf32>
    %c2_115 = arith.constant 2 : index
    %c0_116 = arith.constant 0 : index
    %c0_117 = arith.constant 0 : index
    %c0_118 = arith.constant 0 : index
    %147 = vector.load %arg2[%c2_115, %c0_116, %c0_117, %c0_118] : memref<3x9x8x8xf32, #tpu.memory_space<vmem>>, vector<1x1x8x8xf32>
    %148 = vector.shape_cast %147 : vector<1x1x8x8xf32> to vector<8x8xf32>
    %149 = vector.extract_strided_slice %145 {offsets = [0, 111], sizes = [8, 256], strides = [1, 1]} : vector<8x512xf32> to vector<8x256xf32>
    %cst_119 = arith.constant dense<0.000000e+00> : vector<8x256xf32>
    %150 = tpu.matmul %148, %149, %cst_119 {dimension_numbers = #tpu.dot_dimension_numbers<[1], [0], [0], [1], [0, 0, 1, 1], [], []>} : vector<8x8xf32>, vector<8x256xf32>, vector<8x256xf32> -> vector<8x256xf32>
    %151 = arith.addf %146, %150 : vector<8x256xf32>
    %c2_120 = arith.constant 2 : index
    %c1_121 = arith.constant 1 : index
    %c0_122 = arith.constant 0 : index
    %c0_123 = arith.constant 0 : index
    %152 = vector.load %arg2[%c2_120, %c1_121, %c0_122, %c0_123] : memref<3x9x8x8xf32, #tpu.memory_space<vmem>>, vector<1x1x8x8xf32>
    %153 = vector.shape_cast %152 : vector<1x1x8x8xf32> to vector<8x8xf32>
    %154 = vector.extract_strided_slice %145 {offsets = [0, 112], sizes = [8, 256], strides = [1, 1]} : vector<8x512xf32> to vector<8x256xf32>
    %cst_124 = arith.constant dense<0.000000e+00> : vector<8x256xf32>
    %155 = tpu.matmul %153, %154, %cst_124 {dimension_numbers = #tpu.dot_dimension_numbers<[1], [0], [0], [1], [0, 0, 1, 1], [], []>} : vector<8x8xf32>, vector<8x256xf32>, vector<8x256xf32> -> vector<8x256xf32>
    %156 = arith.addf %151, %155 : vector<8x256xf32>
    %c2_125 = arith.constant 2 : index
    %c2_126 = arith.constant 2 : index
    %c0_127 = arith.constant 0 : index
    %c0_128 = arith.constant 0 : index
    %157 = vector.load %arg2[%c2_125, %c2_126, %c0_127, %c0_128] : memref<3x9x8x8xf32, #tpu.memory_space<vmem>>, vector<1x1x8x8xf32>
    %158 = vector.shape_cast %157 : vector<1x1x8x8xf32> to vector<8x8xf32>
    %159 = vector.extract_strided_slice %145 {offsets = [0, 113], sizes = [8, 256], strides = [1, 1]} : vector<8x512xf32> to vector<8x256xf32>
    %cst_129 = arith.constant dense<0.000000e+00> : vector<8x256xf32>
    %160 = tpu.matmul %158, %159, %cst_129 {dimension_numbers = #tpu.dot_dimension_numbers<[1], [0], [0], [1], [0, 0, 1, 1], [], []>} : vector<8x8xf32>, vector<8x256xf32>, vector<8x256xf32> -> vector<8x256xf32>
    %161 = arith.addf %156, %160 : vector<8x256xf32>
    %c2_130 = arith.constant 2 : index
    %c3_131 = arith.constant 3 : index
    %c0_132 = arith.constant 0 : index
    %c0_133 = arith.constant 0 : index
    %162 = vector.load %arg2[%c2_130, %c3_131, %c0_132, %c0_133] : memref<3x9x8x8xf32, #tpu.memory_space<vmem>>, vector<1x1x8x8xf32>
    %163 = vector.shape_cast %162 : vector<1x1x8x8xf32> to vector<8x8xf32>
    %164 = vector.extract_strided_slice %145 {offsets = [0, 127], sizes = [8, 256], strides = [1, 1]} : vector<8x512xf32> to vector<8x256xf32>
    %cst_134 = arith.constant dense<0.000000e+00> : vector<8x256xf32>
    %165 = tpu.matmul %163, %164, %cst_134 {dimension_numbers = #tpu.dot_dimension_numbers<[1], [0], [0], [1], [0, 0, 1, 1], [], []>} : vector<8x8xf32>, vector<8x256xf32>, vector<8x256xf32> -> vector<8x256xf32>
    %166 = arith.addf %161, %165 : vector<8x256xf32>
    %c2_135 = arith.constant 2 : index
    %c4_136 = arith.constant 4 : index
    %c0_137 = arith.constant 0 : index
    %c0_138 = arith.constant 0 : index
    %167 = vector.load %arg2[%c2_135, %c4_136, %c0_137, %c0_138] : memref<3x9x8x8xf32, #tpu.memory_space<vmem>>, vector<1x1x8x8xf32>
    %168 = vector.shape_cast %167 : vector<1x1x8x8xf32> to vector<8x8xf32>
    %169 = vector.extract_strided_slice %145 {offsets = [0, 128], sizes = [8, 256], strides = [1, 1]} : vector<8x512xf32> to vector<8x256xf32>
    %cst_139 = arith.constant dense<0.000000e+00> : vector<8x256xf32>
    %170 = tpu.matmul %168, %169, %cst_139 {dimension_numbers = #tpu.dot_dimension_numbers<[1], [0], [0], [1], [0, 0, 1, 1], [], []>} : vector<8x8xf32>, vector<8x256xf32>, vector<8x256xf32> -> vector<8x256xf32>
    %171 = arith.addf %166, %170 : vector<8x256xf32>
    %c2_140 = arith.constant 2 : index
    %c5_141 = arith.constant 5 : index
    %c0_142 = arith.constant 0 : index
    %c0_143 = arith.constant 0 : index
    %172 = vector.load %arg2[%c2_140, %c5_141, %c0_142, %c0_143] : memref<3x9x8x8xf32, #tpu.memory_space<vmem>>, vector<1x1x8x8xf32>
    %173 = vector.shape_cast %172 : vector<1x1x8x8xf32> to vector<8x8xf32>
    %174 = vector.extract_strided_slice %145 {offsets = [0, 129], sizes = [8, 256], strides = [1, 1]} : vector<8x512xf32> to vector<8x256xf32>
    %cst_144 = arith.constant dense<0.000000e+00> : vector<8x256xf32>
    %175 = tpu.matmul %173, %174, %cst_144 {dimension_numbers = #tpu.dot_dimension_numbers<[1], [0], [0], [1], [0, 0, 1, 1], [], []>} : vector<8x8xf32>, vector<8x256xf32>, vector<8x256xf32> -> vector<8x256xf32>
    %176 = arith.addf %171, %175 : vector<8x256xf32>
    %c2_145 = arith.constant 2 : index
    %c6_146 = arith.constant 6 : index
    %c0_147 = arith.constant 0 : index
    %c0_148 = arith.constant 0 : index
    %177 = vector.load %arg2[%c2_145, %c6_146, %c0_147, %c0_148] : memref<3x9x8x8xf32, #tpu.memory_space<vmem>>, vector<1x1x8x8xf32>
    %178 = vector.shape_cast %177 : vector<1x1x8x8xf32> to vector<8x8xf32>
    %179 = vector.extract_strided_slice %145 {offsets = [0, 143], sizes = [8, 256], strides = [1, 1]} : vector<8x512xf32> to vector<8x256xf32>
    %cst_149 = arith.constant dense<0.000000e+00> : vector<8x256xf32>
    %180 = tpu.matmul %178, %179, %cst_149 {dimension_numbers = #tpu.dot_dimension_numbers<[1], [0], [0], [1], [0, 0, 1, 1], [], []>} : vector<8x8xf32>, vector<8x256xf32>, vector<8x256xf32> -> vector<8x256xf32>
    %181 = arith.addf %176, %180 : vector<8x256xf32>
    %c2_150 = arith.constant 2 : index
    %c7_151 = arith.constant 7 : index
    %c0_152 = arith.constant 0 : index
    %c0_153 = arith.constant 0 : index
    %182 = vector.load %arg2[%c2_150, %c7_151, %c0_152, %c0_153] : memref<3x9x8x8xf32, #tpu.memory_space<vmem>>, vector<1x1x8x8xf32>
    %183 = vector.shape_cast %182 : vector<1x1x8x8xf32> to vector<8x8xf32>
    %184 = vector.extract_strided_slice %145 {offsets = [0, 144], sizes = [8, 256], strides = [1, 1]} : vector<8x512xf32> to vector<8x256xf32>
    %cst_154 = arith.constant dense<0.000000e+00> : vector<8x256xf32>
    %185 = tpu.matmul %183, %184, %cst_154 {dimension_numbers = #tpu.dot_dimension_numbers<[1], [0], [0], [1], [0, 0, 1, 1], [], []>} : vector<8x8xf32>, vector<8x256xf32>, vector<8x256xf32> -> vector<8x256xf32>
    %186 = arith.addf %181, %185 : vector<8x256xf32>
    %c2_155 = arith.constant 2 : index
    %c8_156 = arith.constant 8 : index
    %c0_157 = arith.constant 0 : index
    %c0_158 = arith.constant 0 : index
    %187 = vector.load %arg2[%c2_155, %c8_156, %c0_157, %c0_158] : memref<3x9x8x8xf32, #tpu.memory_space<vmem>>, vector<1x1x8x8xf32>
    %188 = vector.shape_cast %187 : vector<1x1x8x8xf32> to vector<8x8xf32>
    %189 = vector.extract_strided_slice %145 {offsets = [0, 145], sizes = [8, 256], strides = [1, 1]} : vector<8x512xf32> to vector<8x256xf32>
    %cst_159 = arith.constant dense<0.000000e+00> : vector<8x256xf32>
    %190 = tpu.matmul %188, %189, %cst_159 {dimension_numbers = #tpu.dot_dimension_numbers<[1], [0], [0], [1], [0, 0, 1, 1], [], []>} : vector<8x8xf32>, vector<8x256xf32>, vector<8x256xf32> -> vector<8x256xf32>
    %191 = arith.addf %186, %190 : vector<8x256xf32>
    %cst_160 = arith.constant 0.000000e+00 : f32
    %192 = vector.broadcast %cst_160 : f32 to vector<8x256xf32>
    %193 = arith.maximumf %191, %192 : vector<8x256xf32>
    %c2_161 = arith.constant 2 : index
    %c0_162 = arith.constant 0 : index
    %c0_163 = arith.constant 0 : index
    %194 = vector.load %arg3[%c2_161, %c0_162, %c0_163] : memref<3x8x1xf32, #tpu.memory_space<vmem>>, vector<1x8x1xf32>
    %195 = vector.shape_cast %194 : vector<1x8x1xf32> to vector<8x1xf32>
    %196 = vector.broadcast %195 : vector<8x1xf32> to vector<8x256xf32>
    %197 = arith.mulf %193, %196 : vector<8x256xf32>
    %c2_164 = arith.constant 2 : index
    %c0_165 = arith.constant 0 : index
    %c0_166 = arith.constant 0 : index
    %198 = vector.load %arg4[%c2_164, %c0_165, %c0_166] : memref<3x8x1xf32, #tpu.memory_space<vmem>>, vector<1x8x1xf32>
    %199 = vector.shape_cast %198 : vector<1x8x1xf32> to vector<8x1xf32>
    %200 = vector.broadcast %199 : vector<8x1xf32> to vector<8x256xf32>
    %201 = arith.addf %197, %200 : vector<8x256xf32>
    %c0_167 = arith.constant 0 : index
    %c0_168 = arith.constant 0 : index
    %c0_169 = arith.constant 0 : index
    %202 = vector.load %arg5[%c0_167, %c0_168, %c0_169] : memref<2x8x256xf32, #tpu.memory_space<vmem>>, vector<1x8x256xf32>
    %203 = vector.shape_cast %202 : vector<1x8x256xf32> to vector<8x256xf32>
    %204 = vector.shape_cast %201 : vector<8x256xf32> to vector<1x8x256xf32>
    tpu.vector_store %arg5[%c0_167, %c0_168, %c0_169], %204 {strides = array<i32>} : memref<2x8x256xf32, #tpu.memory_space<vmem>>, vector<1x8x256xf32>,
    %c1_170 = arith.constant 1 : index
    %c0_171 = arith.constant 0 : index
    %c0_172 = arith.constant 0 : index
    %205 = vector.load %arg1[%c1_170, %c0_171, %c0_172] : memref<2x8x384xf32, #tpu.memory_space<vmem>>, vector<1x8x384xf32>
    %206 = vector.shape_cast %205 : vector<1x8x384xf32> to vector<8x384xf32>
    %cst_173 = arith.constant 0.000000e+00 : f32
    %207 = vector.broadcast %cst_173 : f32 to vector<8x256xf32>
    %c0_174 = arith.constant 0 : index
    %c0_175 = arith.constant 0 : index
    %c0_176 = arith.constant 0 : index
    %c0_177 = arith.constant 0 : index
    %208 = vector.load %arg2[%c0_174, %c0_175, %c0_176, %c0_177] : memref<3x9x8x8xf32, #tpu.memory_space<vmem>>, vector<1x1x8x8xf32>
    %209 = vector.shape_cast %208 : vector<1x1x8x8xf32> to vector<8x8xf32>
    %210 = vector.extract_strided_slice %206 {offsets = [0, 0], sizes = [8, 256], strides = [1, 1]} : vector<8x384xf32> to vector<8x256xf32>
    %cst_178 = arith.constant dense<0.000000e+00> : vector<8x256xf32>
    %211 = tpu.matmul %209, %210, %cst_178 {dimension_numbers = #tpu.dot_dimension_numbers<[1], [0], [0], [1], [0, 0, 1, 1], [], []>} : vector<8x8xf32>, vector<8x256xf32>, vector<8x256xf32> -> vector<8x256xf32>
    %212 = arith.addf %207, %211 : vector<8x256xf32>
    %c0_179 = arith.constant 0 : index
    %c1_180 = arith.constant 1 : index
    %c0_181 = arith.constant 0 : index
    %c0_182 = arith.constant 0 : index
    %213 = vector.load %arg2[%c0_179, %c1_180, %c0_181, %c0_182] : memref<3x9x8x8xf32, #tpu.memory_space<vmem>>, vector<1x1x8x8xf32>
    %214 = vector.shape_cast %213 : vector<1x1x8x8xf32> to vector<8x8xf32>
    %215 = vector.extract_strided_slice %206 {offsets = [0, 1], sizes = [8, 256], strides = [1, 1]} : vector<8x384xf32> to vector<8x256xf32>
    %cst_183 = arith.constant dense<0.000000e+00> : vector<8x256xf32>
    %216 = tpu.matmul %214, %215, %cst_183 {dimension_numbers = #tpu.dot_dimension_numbers<[1], [0], [0], [1], [0, 0, 1, 1], [], []>} : vector<8x8xf32>, vector<8x256xf32>, vector<8x256xf32> -> vector<8x256xf32>
    %217 = arith.addf %212, %216 : vector<8x256xf32>
    %c0_184 = arith.constant 0 : index
    %c2_185 = arith.constant 2 : index
    %c0_186 = arith.constant 0 : index
    %c0_187 = arith.constant 0 : index
    %218 = vector.load %arg2[%c0_184, %c2_185, %c0_186, %c0_187] : memref<3x9x8x8xf32, #tpu.memory_space<vmem>>, vector<1x1x8x8xf32>
    %219 = vector.shape_cast %218 : vector<1x1x8x8xf32> to vector<8x8xf32>
    %220 = vector.extract_strided_slice %206 {offsets = [0, 2], sizes = [8, 256], strides = [1, 1]} : vector<8x384xf32> to vector<8x256xf32>
    %cst_188 = arith.constant dense<0.000000e+00> : vector<8x256xf32>
    %221 = tpu.matmul %219, %220, %cst_188 {dimension_numbers = #tpu.dot_dimension_numbers<[1], [0], [0], [1], [0, 0, 1, 1], [], []>} : vector<8x8xf32>, vector<8x256xf32>, vector<8x256xf32> -> vector<8x256xf32>
    %222 = arith.addf %217, %221 : vector<8x256xf32>
    %c0_189 = arith.constant 0 : index
    %c3_190 = arith.constant 3 : index
    %c0_191 = arith.constant 0 : index
    %c0_192 = arith.constant 0 : index
    %223 = vector.load %arg2[%c0_189, %c3_190, %c0_191, %c0_192] : memref<3x9x8x8xf32, #tpu.memory_space<vmem>>, vector<1x1x8x8xf32>
    %224 = vector.shape_cast %223 : vector<1x1x8x8xf32> to vector<8x8xf32>
    %225 = vector.extract_strided_slice %206 {offsets = [0, 16], sizes = [8, 256], strides = [1, 1]} : vector<8x384xf32> to vector<8x256xf32>
    %cst_193 = arith.constant dense<0.000000e+00> : vector<8x256xf32>
    %226 = tpu.matmul %224, %225, %cst_193 {dimension_numbers = #tpu.dot_dimension_numbers<[1], [0], [0], [1], [0, 0, 1, 1], [], []>} : vector<8x8xf32>, vector<8x256xf32>, vector<8x256xf32> -> vector<8x256xf32>
    %227 = arith.addf %222, %226 : vector<8x256xf32>
    %c0_194 = arith.constant 0 : index
    %c4_195 = arith.constant 4 : index
    %c0_196 = arith.constant 0 : index
    %c0_197 = arith.constant 0 : index
    %228 = vector.load %arg2[%c0_194, %c4_195, %c0_196, %c0_197] : memref<3x9x8x8xf32, #tpu.memory_space<vmem>>, vector<1x1x8x8xf32>
    %229 = vector.shape_cast %228 : vector<1x1x8x8xf32> to vector<8x8xf32>
    %230 = vector.extract_strided_slice %206 {offsets = [0, 17], sizes = [8, 256], strides = [1, 1]} : vector<8x384xf32> to vector<8x256xf32>
    %cst_198 = arith.constant dense<0.000000e+00> : vector<8x256xf32>
    %231 = tpu.matmul %229, %230, %cst_198 {dimension_numbers = #tpu.dot_dimension_numbers<[1], [0], [0], [1], [0, 0, 1, 1], [], []>} : vector<8x8xf32>, vector<8x256xf32>, vector<8x256xf32> -> vector<8x256xf32>
    %232 = arith.addf %227, %231 : vector<8x256xf32>
    %c0_199 = arith.constant 0 : index
    %c5_200 = arith.constant 5 : index
    %c0_201 = arith.constant 0 : index
    %c0_202 = arith.constant 0 : index
    %233 = vector.load %arg2[%c0_199, %c5_200, %c0_201, %c0_202] : memref<3x9x8x8xf32, #tpu.memory_space<vmem>>, vector<1x1x8x8xf32>
    %234 = vector.shape_cast %233 : vector<1x1x8x8xf32> to vector<8x8xf32>
    %235 = vector.extract_strided_slice %206 {offsets = [0, 18], sizes = [8, 256], strides = [1, 1]} : vector<8x384xf32> to vector<8x256xf32>
    %cst_203 = arith.constant dense<0.000000e+00> : vector<8x256xf32>
    %236 = tpu.matmul %234, %235, %cst_203 {dimension_numbers = #tpu.dot_dimension_numbers<[1], [0], [0], [1], [0, 0, 1, 1], [], []>} : vector<8x8xf32>, vector<8x256xf32>, vector<8x256xf32> -> vector<8x256xf32>
    %237 = arith.addf %232, %236 : vector<8x256xf32>
    %c0_204 = arith.constant 0 : index
    %c6_205 = arith.constant 6 : index
    %c0_206 = arith.constant 0 : index
    %c0_207 = arith.constant 0 : index
    %238 = vector.load %arg2[%c0_204, %c6_205, %c0_206, %c0_207] : memref<3x9x8x8xf32, #tpu.memory_space<vmem>>, vector<1x1x8x8xf32>
    %239 = vector.shape_cast %238 : vector<1x1x8x8xf32> to vector<8x8xf32>
    %240 = vector.extract_strided_slice %206 {offsets = [0, 32], sizes = [8, 256], strides = [1, 1]} : vector<8x384xf32> to vector<8x256xf32>
    %cst_208 = arith.constant dense<0.000000e+00> : vector<8x256xf32>
    %241 = tpu.matmul %239, %240, %cst_208 {dimension_numbers = #tpu.dot_dimension_numbers<[1], [0], [0], [1], [0, 0, 1, 1], [], []>} : vector<8x8xf32>, vector<8x256xf32>, vector<8x256xf32> -> vector<8x256xf32>
    %242 = arith.addf %237, %241 : vector<8x256xf32>
    %c0_209 = arith.constant 0 : index
    %c7_210 = arith.constant 7 : index
    %c0_211 = arith.constant 0 : index
    %c0_212 = arith.constant 0 : index
    %243 = vector.load %arg2[%c0_209, %c7_210, %c0_211, %c0_212] : memref<3x9x8x8xf32, #tpu.memory_space<vmem>>, vector<1x1x8x8xf32>
    %244 = vector.shape_cast %243 : vector<1x1x8x8xf32> to vector<8x8xf32>
    %245 = vector.extract_strided_slice %206 {offsets = [0, 33], sizes = [8, 256], strides = [1, 1]} : vector<8x384xf32> to vector<8x256xf32>
    %cst_213 = arith.constant dense<0.000000e+00> : vector<8x256xf32>
    %246 = tpu.matmul %244, %245, %cst_213 {dimension_numbers = #tpu.dot_dimension_numbers<[1], [0], [0], [1], [0, 0, 1, 1], [], []>} : vector<8x8xf32>, vector<8x256xf32>, vector<8x256xf32> -> vector<8x256xf32>
    %247 = arith.addf %242, %246 : vector<8x256xf32>
    %c0_214 = arith.constant 0 : index
    %c8_215 = arith.constant 8 : index
    %c0_216 = arith.constant 0 : index
    %c0_217 = arith.constant 0 : index
    %248 = vector.load %arg2[%c0_214, %c8_215, %c0_216, %c0_217] : memref<3x9x8x8xf32, #tpu.memory_space<vmem>>, vector<1x1x8x8xf32>
    %249 = vector.shape_cast %248 : vector<1x1x8x8xf32> to vector<8x8xf32>
    %250 = vector.extract_strided_slice %206 {offsets = [0, 34], sizes = [8, 256], strides = [1, 1]} : vector<8x384xf32> to vector<8x256xf32>
    %cst_218 = arith.constant dense<0.000000e+00> : vector<8x256xf32>
    %251 = tpu.matmul %249, %250, %cst_218 {dimension_numbers = #tpu.dot_dimension_numbers<[1], [0], [0], [1], [0, 0, 1, 1], [], []>} : vector<8x8xf32>, vector<8x256xf32>, vector<8x256xf32> -> vector<8x256xf32>
    %252 = arith.addf %247, %251 : vector<8x256xf32>
    %cst_219 = arith.constant 0.000000e+00 : f32
    %253 = vector.broadcast %cst_219 : f32 to vector<8x256xf32>
    %254 = arith.maximumf %252, %253 : vector<8x256xf32>
    %c0_220 = arith.constant 0 : index
    %c0_221 = arith.constant 0 : index
    %c0_222 = arith.constant 0 : index
    %255 = vector.load %arg3[%c0_220, %c0_221, %c0_222] : memref<3x8x1xf32, #tpu.memory_space<vmem>>, vector<1x8x1xf32>
    %256 = vector.shape_cast %255 : vector<1x8x1xf32> to vector<8x1xf32>
    %257 = vector.broadcast %256 : vector<8x1xf32> to vector<8x256xf32>
    %258 = arith.mulf %254, %257 : vector<8x256xf32>
    %c0_223 = arith.constant 0 : index
    %c0_224 = arith.constant 0 : index
    %c0_225 = arith.constant 0 : index
    %259 = vector.load %arg4[%c0_223, %c0_224, %c0_225] : memref<3x8x1xf32, #tpu.memory_space<vmem>>, vector<1x8x1xf32>
    %260 = vector.shape_cast %259 : vector<1x8x1xf32> to vector<8x1xf32>
    %261 = vector.broadcast %260 : vector<8x1xf32> to vector<8x256xf32>
    %262 = arith.addf %258, %261 : vector<8x256xf32>
    %cst_226 = arith.constant 0.000000e+00 : f32
    %263 = vector.broadcast %cst_226 : f32 to vector<8x256xf32>
    %264 = arith.select %23, %262, %263 : vector<8x256xi1>, vector<8x256xf32>
    %c0_227 = arith.constant 0 : index
    %c128_228 = arith.constant 128 : index
    %265 = vector.load %arg6[%c0_227, %c128_228] : memref<8x512xf32, #tpu.memory_space<vmem>>, vector<8x256xf32>
    tpu.vector_store %arg6[%c0_227, %c128_228], %264 {strides = array<i32>} : memref<8x512xf32, #tpu.memory_space<vmem>>, vector<8x256xf32>,
    %c0_229 = arith.constant 0 : index
    %c0_230 = arith.constant 0 : index
    %266 = vector.load %arg6[%c0_229, %c0_230] : memref<8x512xf32, #tpu.memory_space<vmem>>, vector<8x512xf32>
    %cst_231 = arith.constant 0.000000e+00 : f32
    %267 = vector.broadcast %cst_231 : f32 to vector<8x256xf32>
    %c1_232 = arith.constant 1 : index
    %c0_233 = arith.constant 0 : index
    %c0_234 = arith.constant 0 : index
    %c0_235 = arith.constant 0 : index
    %268 = vector.load %arg2[%c1_232, %c0_233, %c0_234, %c0_235] : memref<3x9x8x8xf32, #tpu.memory_space<vmem>>, vector<1x1x8x8xf32>
    %269 = vector.shape_cast %268 : vector<1x1x8x8xf32> to vector<8x8xf32>
    %270 = vector.extract_strided_slice %266 {offsets = [0, 111], sizes = [8, 256], strides = [1, 1]} : vector<8x512xf32> to vector<8x256xf32>
    %cst_236 = arith.constant dense<0.000000e+00> : vector<8x256xf32>
    %271 = tpu.matmul %269, %270, %cst_236 {dimension_numbers = #tpu.dot_dimension_numbers<[1], [0], [0], [1], [0, 0, 1, 1], [], []>} : vector<8x8xf32>, vector<8x256xf32>, vector<8x256xf32> -> vector<8x256xf32>
    %272 = arith.addf %267, %271 : vector<8x256xf32>
    %c1_237 = arith.constant 1 : index
    %c1_238 = arith.constant 1 : index
    %c0_239 = arith.constant 0 : index
    %c0_240 = arith.constant 0 : index
    %273 = vector.load %arg2[%c1_237, %c1_238, %c0_239, %c0_240] : memref<3x9x8x8xf32, #tpu.memory_space<vmem>>, vector<1x1x8x8xf32>
    %274 = vector.shape_cast %273 : vector<1x1x8x8xf32> to vector<8x8xf32>
    %275 = vector.extract_strided_slice %266 {offsets = [0, 112], sizes = [8, 256], strides = [1, 1]} : vector<8x512xf32> to vector<8x256xf32>
    %cst_241 = arith.constant dense<0.000000e+00> : vector<8x256xf32>
    %276 = tpu.matmul %274, %275, %cst_241 {dimension_numbers = #tpu.dot_dimension_numbers<[1], [0], [0], [1], [0, 0, 1, 1], [], []>} : vector<8x8xf32>, vector<8x256xf32>, vector<8x256xf32> -> vector<8x256xf32>
    %277 = arith.addf %272, %276 : vector<8x256xf32>
    %c1_242 = arith.constant 1 : index
    %c2_243 = arith.constant 2 : index
    %c0_244 = arith.constant 0 : index
    %c0_245 = arith.constant 0 : index
    %278 = vector.load %arg2[%c1_242, %c2_243, %c0_244, %c0_245] : memref<3x9x8x8xf32, #tpu.memory_space<vmem>>, vector<1x1x8x8xf32>
    %279 = vector.shape_cast %278 : vector<1x1x8x8xf32> to vector<8x8xf32>
    %280 = vector.extract_strided_slice %266 {offsets = [0, 113], sizes = [8, 256], strides = [1, 1]} : vector<8x512xf32> to vector<8x256xf32>
    %cst_246 = arith.constant dense<0.000000e+00> : vector<8x256xf32>
    %281 = tpu.matmul %279, %280, %cst_246 {dimension_numbers = #tpu.dot_dimension_numbers<[1], [0], [0], [1], [0, 0, 1, 1], [], []>} : vector<8x8xf32>, vector<8x256xf32>, vector<8x256xf32> -> vector<8x256xf32>
    %282 = arith.addf %277, %281 : vector<8x256xf32>
    %c1_247 = arith.constant 1 : index
    %c3_248 = arith.constant 3 : index
    %c0_249 = arith.constant 0 : index
    %c0_250 = arith.constant 0 : index
    %283 = vector.load %arg2[%c1_247, %c3_248, %c0_249, %c0_250] : memref<3x9x8x8xf32, #tpu.memory_space<vmem>>, vector<1x1x8x8xf32>
    %284 = vector.shape_cast %283 : vector<1x1x8x8xf32> to vector<8x8xf32>
    %285 = vector.extract_strided_slice %266 {offsets = [0, 127], sizes = [8, 256], strides = [1, 1]} : vector<8x512xf32> to vector<8x256xf32>
    %cst_251 = arith.constant dense<0.000000e+00> : vector<8x256xf32>
    %286 = tpu.matmul %284, %285, %cst_251 {dimension_numbers = #tpu.dot_dimension_numbers<[1], [0], [0], [1], [0, 0, 1, 1], [], []>} : vector<8x8xf32>, vector<8x256xf32>, vector<8x256xf32> -> vector<8x256xf32>
    %287 = arith.addf %282, %286 : vector<8x256xf32>
    %c1_252 = arith.constant 1 : index
    %c4_253 = arith.constant 4 : index
    %c0_254 = arith.constant 0 : index
    %c0_255 = arith.constant 0 : index
    %288 = vector.load %arg2[%c1_252, %c4_253, %c0_254, %c0_255] : memref<3x9x8x8xf32, #tpu.memory_space<vmem>>, vector<1x1x8x8xf32>
    %289 = vector.shape_cast %288 : vector<1x1x8x8xf32> to vector<8x8xf32>
    %290 = vector.extract_strided_slice %266 {offsets = [0, 128], sizes = [8, 256], strides = [1, 1]} : vector<8x512xf32> to vector<8x256xf32>
    %cst_256 = arith.constant dense<0.000000e+00> : vector<8x256xf32>
    %291 = tpu.matmul %289, %290, %cst_256 {dimension_numbers = #tpu.dot_dimension_numbers<[1], [0], [0], [1], [0, 0, 1, 1], [], []>} : vector<8x8xf32>, vector<8x256xf32>, vector<8x256xf32> -> vector<8x256xf32>
    %292 = arith.addf %287, %291 : vector<8x256xf32>
    %c1_257 = arith.constant 1 : index
    %c5_258 = arith.constant 5 : index
    %c0_259 = arith.constant 0 : index
    %c0_260 = arith.constant 0 : index
    %293 = vector.load %arg2[%c1_257, %c5_258, %c0_259, %c0_260] : memref<3x9x8x8xf32, #tpu.memory_space<vmem>>, vector<1x1x8x8xf32>
    %294 = vector.shape_cast %293 : vector<1x1x8x8xf32> to vector<8x8xf32>
    %295 = vector.extract_strided_slice %266 {offsets = [0, 129], sizes = [8, 256], strides = [1, 1]} : vector<8x512xf32> to vector<8x256xf32>
    %cst_261 = arith.constant dense<0.000000e+00> : vector<8x256xf32>
    %296 = tpu.matmul %294, %295, %cst_261 {dimension_numbers = #tpu.dot_dimension_numbers<[1], [0], [0], [1], [0, 0, 1, 1], [], []>} : vector<8x8xf32>, vector<8x256xf32>, vector<8x256xf32> -> vector<8x256xf32>
    %297 = arith.addf %292, %296 : vector<8x256xf32>
    %c1_262 = arith.constant 1 : index
    %c6_263 = arith.constant 6 : index
    %c0_264 = arith.constant 0 : index
    %c0_265 = arith.constant 0 : index
    %298 = vector.load %arg2[%c1_262, %c6_263, %c0_264, %c0_265] : memref<3x9x8x8xf32, #tpu.memory_space<vmem>>, vector<1x1x8x8xf32>
    %299 = vector.shape_cast %298 : vector<1x1x8x8xf32> to vector<8x8xf32>
    %300 = vector.extract_strided_slice %266 {offsets = [0, 143], sizes = [8, 256], strides = [1, 1]} : vector<8x512xf32> to vector<8x256xf32>
    %cst_266 = arith.constant dense<0.000000e+00> : vector<8x256xf32>
    %301 = tpu.matmul %299, %300, %cst_266 {dimension_numbers = #tpu.dot_dimension_numbers<[1], [0], [0], [1], [0, 0, 1, 1], [], []>} : vector<8x8xf32>, vector<8x256xf32>, vector<8x256xf32> -> vector<8x256xf32>
    %302 = arith.addf %297, %301 : vector<8x256xf32>
    %c1_267 = arith.constant 1 : index
    %c7_268 = arith.constant 7 : index
    %c0_269 = arith.constant 0 : index
    %c0_270 = arith.constant 0 : index
    %303 = vector.load %arg2[%c1_267, %c7_268, %c0_269, %c0_270] : memref<3x9x8x8xf32, #tpu.memory_space<vmem>>, vector<1x1x8x8xf32>
    %304 = vector.shape_cast %303 : vector<1x1x8x8xf32> to vector<8x8xf32>
    %305 = vector.extract_strided_slice %266 {offsets = [0, 144], sizes = [8, 256], strides = [1, 1]} : vector<8x512xf32> to vector<8x256xf32>
    %cst_271 = arith.constant dense<0.000000e+00> : vector<8x256xf32>
    %306 = tpu.matmul %304, %305, %cst_271 {dimension_numbers = #tpu.dot_dimension_numbers<[1], [0], [0], [1], [0, 0, 1, 1], [], []>} : vector<8x8xf32>, vector<8x256xf32>, vector<8x256xf32> -> vector<8x256xf32>
    %307 = arith.addf %302, %306 : vector<8x256xf32>
    %c1_272 = arith.constant 1 : index
    %c8_273 = arith.constant 8 : index
    %c0_274 = arith.constant 0 : index
    %c0_275 = arith.constant 0 : index
    %308 = vector.load %arg2[%c1_272, %c8_273, %c0_274, %c0_275] : memref<3x9x8x8xf32, #tpu.memory_space<vmem>>, vector<1x1x8x8xf32>
    %309 = vector.shape_cast %308 : vector<1x1x8x8xf32> to vector<8x8xf32>
    %310 = vector.extract_strided_slice %266 {offsets = [0, 145], sizes = [8, 256], strides = [1, 1]} : vector<8x512xf32> to vector<8x256xf32>
    %cst_276 = arith.constant dense<0.000000e+00> : vector<8x256xf32>
    %311 = tpu.matmul %309, %310, %cst_276 {dimension_numbers = #tpu.dot_dimension_numbers<[1], [0], [0], [1], [0, 0, 1, 1], [], []>} : vector<8x8xf32>, vector<8x256xf32>, vector<8x256xf32> -> vector<8x256xf32>
    %312 = arith.addf %307, %311 : vector<8x256xf32>
    %cst_277 = arith.constant 0.000000e+00 : f32
    %313 = vector.broadcast %cst_277 : f32 to vector<8x256xf32>
    %314 = arith.maximumf %312, %313 : vector<8x256xf32>
    %c1_278 = arith.constant 1 : index
    %c0_279 = arith.constant 0 : index
    %c0_280 = arith.constant 0 : index
    %315 = vector.load %arg3[%c1_278, %c0_279, %c0_280] : memref<3x8x1xf32, #tpu.memory_space<vmem>>, vector<1x8x1xf32>
    %316 = vector.shape_cast %315 : vector<1x8x1xf32> to vector<8x1xf32>
    %317 = vector.broadcast %316 : vector<8x1xf32> to vector<8x256xf32>
    %318 = arith.mulf %314, %317 : vector<8x256xf32>
    %c1_281 = arith.constant 1 : index
    %c0_282 = arith.constant 0 : index
    %c0_283 = arith.constant 0 : index
    %319 = vector.load %arg4[%c1_281, %c0_282, %c0_283] : memref<3x8x1xf32, #tpu.memory_space<vmem>>, vector<1x8x1xf32>
    %320 = vector.shape_cast %319 : vector<1x8x1xf32> to vector<8x1xf32>
    %321 = vector.broadcast %320 : vector<8x1xf32> to vector<8x256xf32>
    %322 = arith.addf %318, %321 : vector<8x256xf32>
    %cst_284 = arith.constant 0.000000e+00 : f32
    %323 = vector.broadcast %cst_284 : f32 to vector<8x256xf32>
    %324 = arith.select %23, %322, %323 : vector<8x256xi1>, vector<8x256xf32>
    %c0_285 = arith.constant 0 : index
    %c128_286 = arith.constant 128 : index
    %325 = vector.load %arg6[%c0_285, %c128_286] : memref<8x512xf32, #tpu.memory_space<vmem>>, vector<8x256xf32>
    tpu.vector_store %arg6[%c0_285, %c128_286], %324 {strides = array<i32>} : memref<8x512xf32, #tpu.memory_space<vmem>>, vector<8x256xf32>,
    %c0_287 = arith.constant 0 : index
    %c0_288 = arith.constant 0 : index
    %326 = vector.load %arg6[%c0_287, %c0_288] : memref<8x512xf32, #tpu.memory_space<vmem>>, vector<8x512xf32>
    %cst_289 = arith.constant 0.000000e+00 : f32
    %327 = vector.broadcast %cst_289 : f32 to vector<8x256xf32>
    %c2_290 = arith.constant 2 : index
    %c0_291 = arith.constant 0 : index
    %c0_292 = arith.constant 0 : index
    %c0_293 = arith.constant 0 : index
    %328 = vector.load %arg2[%c2_290, %c0_291, %c0_292, %c0_293] : memref<3x9x8x8xf32, #tpu.memory_space<vmem>>, vector<1x1x8x8xf32>
    %329 = vector.shape_cast %328 : vector<1x1x8x8xf32> to vector<8x8xf32>
    %330 = vector.extract_strided_slice %326 {offsets = [0, 111], sizes = [8, 256], strides = [1, 1]} : vector<8x512xf32> to vector<8x256xf32>
    %cst_294 = arith.constant dense<0.000000e+00> : vector<8x256xf32>
    %331 = tpu.matmul %329, %330, %cst_294 {dimension_numbers = #tpu.dot_dimension_numbers<[1], [0], [0], [1], [0, 0, 1, 1], [], []>} : vector<8x8xf32>, vector<8x256xf32>, vector<8x256xf32> -> vector<8x256xf32>
    %332 = arith.addf %327, %331 : vector<8x256xf32>
    %c2_295 = arith.constant 2 : index
    %c1_296 = arith.constant 1 : index
    %c0_297 = arith.constant 0 : index
    %c0_298 = arith.constant 0 : index
    %333 = vector.load %arg2[%c2_295, %c1_296, %c0_297, %c0_298] : memref<3x9x8x8xf32, #tpu.memory_space<vmem>>, vector<1x1x8x8xf32>
    %334 = vector.shape_cast %333 : vector<1x1x8x8xf32> to vector<8x8xf32>
    %335 = vector.extract_strided_slice %326 {offsets = [0, 112], sizes = [8, 256], strides = [1, 1]} : vector<8x512xf32> to vector<8x256xf32>
    %cst_299 = arith.constant dense<0.000000e+00> : vector<8x256xf32>
    %336 = tpu.matmul %334, %335, %cst_299 {dimension_numbers = #tpu.dot_dimension_numbers<[1], [0], [0], [1], [0, 0, 1, 1], [], []>} : vector<8x8xf32>, vector<8x256xf32>, vector<8x256xf32> -> vector<8x256xf32>
    %337 = arith.addf %332, %336 : vector<8x256xf32>
    %c2_300 = arith.constant 2 : index
    %c2_301 = arith.constant 2 : index
    %c0_302 = arith.constant 0 : index
    %c0_303 = arith.constant 0 : index
    %338 = vector.load %arg2[%c2_300, %c2_301, %c0_302, %c0_303] : memref<3x9x8x8xf32, #tpu.memory_space<vmem>>, vector<1x1x8x8xf32>
    %339 = vector.shape_cast %338 : vector<1x1x8x8xf32> to vector<8x8xf32>
    %340 = vector.extract_strided_slice %326 {offsets = [0, 113], sizes = [8, 256], strides = [1, 1]} : vector<8x512xf32> to vector<8x256xf32>
    %cst_304 = arith.constant dense<0.000000e+00> : vector<8x256xf32>
    %341 = tpu.matmul %339, %340, %cst_304 {dimension_numbers = #tpu.dot_dimension_numbers<[1], [0], [0], [1], [0, 0, 1, 1], [], []>} : vector<8x8xf32>, vector<8x256xf32>, vector<8x256xf32> -> vector<8x256xf32>
    %342 = arith.addf %337, %341 : vector<8x256xf32>
    %c2_305 = arith.constant 2 : index
    %c3_306 = arith.constant 3 : index
    %c0_307 = arith.constant 0 : index
    %c0_308 = arith.constant 0 : index
    %343 = vector.load %arg2[%c2_305, %c3_306, %c0_307, %c0_308] : memref<3x9x8x8xf32, #tpu.memory_space<vmem>>, vector<1x1x8x8xf32>
    %344 = vector.shape_cast %343 : vector<1x1x8x8xf32> to vector<8x8xf32>
    %345 = vector.extract_strided_slice %326 {offsets = [0, 127], sizes = [8, 256], strides = [1, 1]} : vector<8x512xf32> to vector<8x256xf32>
    %cst_309 = arith.constant dense<0.000000e+00> : vector<8x256xf32>
    %346 = tpu.matmul %344, %345, %cst_309 {dimension_numbers = #tpu.dot_dimension_numbers<[1], [0], [0], [1], [0, 0, 1, 1], [], []>} : vector<8x8xf32>, vector<8x256xf32>, vector<8x256xf32> -> vector<8x256xf32>
    %347 = arith.addf %342, %346 : vector<8x256xf32>
    %c2_310 = arith.constant 2 : index
    %c4_311 = arith.constant 4 : index
    %c0_312 = arith.constant 0 : index
    %c0_313 = arith.constant 0 : index
    %348 = vector.load %arg2[%c2_310, %c4_311, %c0_312, %c0_313] : memref<3x9x8x8xf32, #tpu.memory_space<vmem>>, vector<1x1x8x8xf32>
    %349 = vector.shape_cast %348 : vector<1x1x8x8xf32> to vector<8x8xf32>
    %350 = vector.extract_strided_slice %326 {offsets = [0, 128], sizes = [8, 256], strides = [1, 1]} : vector<8x512xf32> to vector<8x256xf32>
    %cst_314 = arith.constant dense<0.000000e+00> : vector<8x256xf32>
    %351 = tpu.matmul %349, %350, %cst_314 {dimension_numbers = #tpu.dot_dimension_numbers<[1], [0], [0], [1], [0, 0, 1, 1], [], []>} : vector<8x8xf32>, vector<8x256xf32>, vector<8x256xf32> -> vector<8x256xf32>
    %352 = arith.addf %347, %351 : vector<8x256xf32>
    %c2_315 = arith.constant 2 : index
    %c5_316 = arith.constant 5 : index
    %c0_317 = arith.constant 0 : index
    %c0_318 = arith.constant 0 : index
    %353 = vector.load %arg2[%c2_315, %c5_316, %c0_317, %c0_318] : memref<3x9x8x8xf32, #tpu.memory_space<vmem>>, vector<1x1x8x8xf32>
    %354 = vector.shape_cast %353 : vector<1x1x8x8xf32> to vector<8x8xf32>
    %355 = vector.extract_strided_slice %326 {offsets = [0, 129], sizes = [8, 256], strides = [1, 1]} : vector<8x512xf32> to vector<8x256xf32>
    %cst_319 = arith.constant dense<0.000000e+00> : vector<8x256xf32>
    %356 = tpu.matmul %354, %355, %cst_319 {dimension_numbers = #tpu.dot_dimension_numbers<[1], [0], [0], [1], [0, 0, 1, 1], [], []>} : vector<8x8xf32>, vector<8x256xf32>, vector<8x256xf32> -> vector<8x256xf32>
    %357 = arith.addf %352, %356 : vector<8x256xf32>
    %c2_320 = arith.constant 2 : index
    %c6_321 = arith.constant 6 : index
    %c0_322 = arith.constant 0 : index
    %c0_323 = arith.constant 0 : index
    %358 = vector.load %arg2[%c2_320, %c6_321, %c0_322, %c0_323] : memref<3x9x8x8xf32, #tpu.memory_space<vmem>>, vector<1x1x8x8xf32>
    %359 = vector.shape_cast %358 : vector<1x1x8x8xf32> to vector<8x8xf32>
    %360 = vector.extract_strided_slice %326 {offsets = [0, 143], sizes = [8, 256], strides = [1, 1]} : vector<8x512xf32> to vector<8x256xf32>
    %cst_324 = arith.constant dense<0.000000e+00> : vector<8x256xf32>
    %361 = tpu.matmul %359, %360, %cst_324 {dimension_numbers = #tpu.dot_dimension_numbers<[1], [0], [0], [1], [0, 0, 1, 1], [], []>} : vector<8x8xf32>, vector<8x256xf32>, vector<8x256xf32> -> vector<8x256xf32>
    %362 = arith.addf %357, %361 : vector<8x256xf32>
    %c2_325 = arith.constant 2 : index
    %c7_326 = arith.constant 7 : index
    %c0_327 = arith.constant 0 : index
    %c0_328 = arith.constant 0 : index
    %363 = vector.load %arg2[%c2_325, %c7_326, %c0_327, %c0_328] : memref<3x9x8x8xf32, #tpu.memory_space<vmem>>, vector<1x1x8x8xf32>
    %364 = vector.shape_cast %363 : vector<1x1x8x8xf32> to vector<8x8xf32>
    %365 = vector.extract_strided_slice %326 {offsets = [0, 144], sizes = [8, 256], strides = [1, 1]} : vector<8x512xf32> to vector<8x256xf32>
    %cst_329 = arith.constant dense<0.000000e+00> : vector<8x256xf32>
    %366 = tpu.matmul %364, %365, %cst_329 {dimension_numbers = #tpu.dot_dimension_numbers<[1], [0], [0], [1], [0, 0, 1, 1], [], []>} : vector<8x8xf32>, vector<8x256xf32>, vector<8x256xf32> -> vector<8x256xf32>
    %367 = arith.addf %362, %366 : vector<8x256xf32>
    %c2_330 = arith.constant 2 : index
    %c8_331 = arith.constant 8 : index
    %c0_332 = arith.constant 0 : index
    %c0_333 = arith.constant 0 : index
    %368 = vector.load %arg2[%c2_330, %c8_331, %c0_332, %c0_333] : memref<3x9x8x8xf32, #tpu.memory_space<vmem>>, vector<1x1x8x8xf32>
    %369 = vector.shape_cast %368 : vector<1x1x8x8xf32> to vector<8x8xf32>
    %370 = vector.extract_strided_slice %326 {offsets = [0, 145], sizes = [8, 256], strides = [1, 1]} : vector<8x512xf32> to vector<8x256xf32>
    %cst_334 = arith.constant dense<0.000000e+00> : vector<8x256xf32>
    %371 = tpu.matmul %369, %370, %cst_334 {dimension_numbers = #tpu.dot_dimension_numbers<[1], [0], [0], [1], [0, 0, 1, 1], [], []>} : vector<8x8xf32>, vector<8x256xf32>, vector<8x256xf32> -> vector<8x256xf32>
    %372 = arith.addf %367, %371 : vector<8x256xf32>
    %cst_335 = arith.constant 0.000000e+00 : f32
    %373 = vector.broadcast %cst_335 : f32 to vector<8x256xf32>
    %374 = arith.maximumf %372, %373 : vector<8x256xf32>
    %c2_336 = arith.constant 2 : index
    %c0_337 = arith.constant 0 : index
    %c0_338 = arith.constant 0 : index
    %375 = vector.load %arg3[%c2_336, %c0_337, %c0_338] : memref<3x8x1xf32, #tpu.memory_space<vmem>>, vector<1x8x1xf32>
    %376 = vector.shape_cast %375 : vector<1x8x1xf32> to vector<8x1xf32>
    %377 = vector.broadcast %376 : vector<8x1xf32> to vector<8x256xf32>
    %378 = arith.mulf %374, %377 : vector<8x256xf32>
    %c2_339 = arith.constant 2 : index
    %c0_340 = arith.constant 0 : index
    %c0_341 = arith.constant 0 : index
    %379 = vector.load %arg4[%c2_339, %c0_340, %c0_341] : memref<3x8x1xf32, #tpu.memory_space<vmem>>, vector<1x8x1xf32>
    %380 = vector.shape_cast %379 : vector<1x8x1xf32> to vector<8x1xf32>
    %381 = vector.broadcast %380 : vector<8x1xf32> to vector<8x256xf32>
    %382 = arith.addf %378, %381 : vector<8x256xf32>
    %c1_342 = arith.constant 1 : index
    %c0_343 = arith.constant 0 : index
    %c0_344 = arith.constant 0 : index
    %383 = vector.load %arg5[%c1_342, %c0_343, %c0_344] : memref<2x8x256xf32, #tpu.memory_space<vmem>>, vector<1x8x256xf32>
    %384 = vector.shape_cast %383 : vector<1x8x256xf32> to vector<8x256xf32>
    %385 = vector.shape_cast %382 : vector<8x256xf32> to vector<1x8x256xf32>
    tpu.vector_store %arg5[%c1_342, %c0_343, %c0_344], %385 {strides = array<i32>} : memref<2x8x256xf32, #tpu.memory_space<vmem>>, vector<1x8x256xf32>,
    return
  }
  func.func @transform_0(%arg0: i32) -> (i32, i32, i32) {
    %c0_i32 = arith.constant 0 : i32
    %c0_i32_0 = arith.constant 0 : i32
    %c0_i32_1 = arith.constant 0 : i32
    return %arg0, %c0_i32, %c0_i32_0 : i32, i32, i32
  }
  func.func @transform_1(%arg0: i32) -> (i32, i32, i32, i32) {
    %c0_i32 = arith.constant 0 : i32
    %c0_i32_0 = arith.constant 0 : i32
    %c0_i32_1 = arith.constant 0 : i32
    %c0_i32_2 = arith.constant 0 : i32
    %c0_i32_3 = arith.constant 0 : i32
    return %c0_i32, %c0_i32_0, %c0_i32_1, %c0_i32_2 : i32, i32, i32, i32
  }
  func.func @transform_2(%arg0: i32) -> (i32, i32, i32) {
    %c0_i32 = arith.constant 0 : i32
    %c0_i32_0 = arith.constant 0 : i32
    %c0_i32_1 = arith.constant 0 : i32
    %c0_i32_2 = arith.constant 0 : i32
    return %c0_i32, %c0_i32_0, %c0_i32_1 : i32, i32, i32
  }
  func.func @transform_3(%arg0: i32) -> (i32, i32, i32) {
    %c0_i32 = arith.constant 0 : i32
    %c0_i32_0 = arith.constant 0 : i32
    %c0_i32_1 = arith.constant 0 : i32
    %c0_i32_2 = arith.constant 0 : i32
    return %c0_i32, %c0_i32_0, %c0_i32_1 : i32, i32, i32
  }
  func.func @transform_4(%arg0: i32) -> (i32, i32, i32) {
    %c0_i32 = arith.constant 0 : i32
    %c0_i32_0 = arith.constant 0 : i32
    %c0_i32_1 = arith.constant 0 : i32
    return %arg0, %c0_i32, %c0_i32_0 : i32, i32, i32
  }
}

</mosaic_0001>

<bundles_post_ra>
// kernel: tpu_custom_call.1
= control target key start
LH: loop header
LB: loop body
LE: loop exit
PB: predicated region body
PF: predicated region fallthrough
CT: control target
= control target key end

     0   :  { %s5070_s19 = smov 127   ;;  %v5902_v3 = vmov 0.0   ;;  %s5897_s0 = inlined_call_operand.vmem [shape: f32[2,8,384], index: 0, kind: input, shape index: {}]   ;;  %s5898_s1 = inlined_call_operand.vmem [shape: f32[3,9,8,8], index: 1, kind: input, shape index: {}]   ;;  %s5899_s2 = inlined_call_operand.vmem [shape: f32[3,8,1], index: 2, kind: input, shape index: {}]   ;;  %s5900_s3 = inlined_call_operand.vmem [shape: f32[3,8,1], index: 3, kind: input, shape index: {}]   ;;  %s5901_s4 = inlined_call_operand.hbm [shape: f32[2,8,256], index: 4, kind: output, shape index: {}]  }
   0x1   :  { %v56_v0 = vld [vmem:[%s5897_s0 + $0x8] sm:$0xff]  ;;  %v55_v1 = vld [vmem:[%s5897_s0] sm:$0xff]  ;;  %v57_v2 = vld [vmem:[%s5897_s0 + $0x10] sm:$0xff]  ;;  %143 = vmatprep.mubr.f32.mxu0 %v5902_v3 }
   0x2   :  { %66 = vrot.lane.b32.xlu0 %v56_v0, %s5070_s19  ;;  %64 = vrot.lane.b32.xlu1 %v55_v1, %s5070_s19 }
   0x3   :  { %183 = vmatprep.subr.mxu1 %v56_v0 }
   0x4   :  { %9 = vsyncpa [#allocation4], 0  ;;  %184 = vmatpush1.msra.mxu1 %v55_v1  ;;  %217 = vmatprep.mubr.f32.mxu1 %v5902_v3  ;;  %v58_v4 = vld [vmem:[%s5898_s1] sm:$0xff]  ;;  %s5072_s24 = smov 126   ;;  %vm75_vm0 = vcmask 64512   ;;  %s5073_s25 = smov 112  }
   0x5   :  { %4905 = vmatmul.mubr.msk.f32.vlgmr.msra.gmra.mxu1 %vm75_vm0, %v58_v4  ;;  %s5074_s26 = smov 111   ;;  %s5075_s27 = smov 110   ;;  %v5077_v5 = vmov 0   ;;  %v5155_v6 = vld [vmem:[%s5899_s2] sm:$0xff]  ;;  %vm70_vm1 = vcmask 1039360   ;;  %v5168_v13 = vld [vmem:[%s5898_s1 + $0x8] sm:$0xff] }
   0x6   :  { %68 = vrot.lane.b32.xlu0 %v57_v2, %s5070_s19  ;;  %228 = vrot.lane.b32.xlu1 %v56_v0, %s5072_s24  ;;  %s5076_s28 = smov 96   ;;  %s5078_s29 = smov 95   ;;  %v5160_v7 = vld [vmem:[%s5900_s3] sm:$0xff]  ;;  %vm232_vm2 = vcmask 1031168   ;;  %v5179_v19 = vld [vmem:[%s5898_s1 + $0x10] sm:$0xff]  ;;  %vm321_vm3 = vcmask 916480  }
   0x7   :  { %393 = vmatprep.mubr.f32.mxu1 %v5902_v3  ;;  %5045 = vset.pattern.permute.xlu0 %v5077_v5  ;;  %s5079_s30 = smov 94   ;;  %v5188_v25 = vld [vmem:[%s5898_s1 + $0x18] sm:$0xff]  ;;  %vm410_vm4 = vcmask 908288   ;;  %v5199_v31 = vld [vmem:[%s5898_s1 + $0x20] sm:$0xff]  ;;  %vm499_vm5 = vcmask 900096   ;;  %v5208_v37 = vld [vmem:[%s5898_s1 + $0x28] sm:$0xff] }
   0x8   :  { %5046 = vset.pattern.permute.xlu1 %v5077_v5  ;;  %vm588_vm6 = vcmask 785408   ;;  %v5219_v43 = vld [vmem:[%s5898_s1 + $0x30] sm:$0xff]  ;;  %vm677_vm7 = vcmask 777216   ;;  %v5228_v49 = vld [vmem:[%s5898_s1 + $0x38] sm:$0xff]  ;;  %vm766_vm8 = vcmask 769024   ;;  %v5239_v55 = vld [vmem:[%s5898_s1 + $0x40] sm:$0xff] }
   0x9   :  { %s5080_s7 = smov 17   ;;  %s5081_s8 = smov 16   ;;  %vm886_vm13 = vcmask 130048   ;;  %vm971_vm14 = vcmask 138240   ;;  %vm1058_vm15 = vcmask 121856  }
   0xa   :  { %230 = vrot.lane.b32.xlu0 %v57_v2, %s5072_s24  ;;  %226 = vrot.lane.b32.xlu1 %v55_v1, %s5072_s24  ;;  %s5082_s9 = smov 1   ;;  %s5083_s10 = smov 15  }
   0xb   :  { %s5084_s11 = smov 113  }
   0xe   :  { %317 = vrot.lane.b32.xlu0 %v56_v0, %s5073_s25  ;;  %319 = vrot.lane.b32.xlu1 %v57_v2, %s5073_s25 }
  0x12   :  { %315 = vrot.lane.b32.xlu0 %v55_v1, %s5073_s25  ;;  %406 = vrot.lane.b32.xlu1 %v56_v0, %s5074_s26 }
  0x16   :  { %408 = vrot.lane.b32.xlu0 %v57_v2, %s5074_s26  ;;  %404 = vrot.lane.b32.xlu1 %v55_v1, %s5074_s26 }
  0x1a   :  { %495 = vrot.lane.b32.xlu0 %v56_v0, %s5075_s27  ;;  %497 = vrot.lane.b32.xlu1 %v57_v2, %s5075_s27 }
  0x1e   :  { %493 = vrot.lane.b32.xlu0 %v55_v1, %s5075_s27  ;;  %584 = vrot.lane.b32.xlu1 %v56_v0, %s5076_s28 }
  0x22   :  { %586 = vrot.lane.b32.xlu0 %v57_v2, %s5076_s28  ;;  %582 = vrot.lane.b32.xlu1 %v55_v1, %s5076_s28 }
  0x26   :  { %673 = vrot.lane.b32.xlu0 %v56_v0, %s5078_s29  ;;  %675 = vrot.lane.b32.xlu1 %v57_v2, %s5078_s29 }
  0x2a   :  { %671 = vrot.lane.b32.xlu0 %v55_v1, %s5078_s29  ;;  %762 = vrot.lane.b32.xlu1 %v56_v0, %s5079_s30 }
  0x2e   :  { %764 = vrot.lane.b32.xlu0 %v57_v2, %s5079_s30  ;;  %760 = vrot.lane.b32.xlu1 %v55_v1, %s5079_s30 }
  0x32   :  { %852 = vperm.xlu0 %5045, %v5155_v6   ;;  %860 = vperm.xlu1 %5046, %v5160_v7  }
  0x36   :  { %965 = vrot.lane.b32.xlu0 %v5902_v3, %s5080_s7  ;;  %880 = vrot.lane.b32.xlu1 %v5902_v3, %s5081_s8 }
  0x3a   :  { %1141 = vrot.lane.b32.xlu0 %v5902_v3, %s5082_s9  ;;  %1052 = vrot.lane.b32.xlu1 %v5902_v3, %s5083_s10 }
  0x3e   :  { %1313 = vrot.lane.b32.xlu0 %v5902_v3, %s5070_s19  ;;  %1401 = vrot.lane.b32.xlu1 %v5902_v3, %s5084_s11 }
  0x74   :  { %v67_v8 = vpop.permute.xlu0 %66  ;;  %v65_v9 = vpop.permute.xlu1 %64 }
  0x75   :  { %v71_v14 = vsel %vm70_vm1, %v65_v9, %v67_v8 }
  0x78   :  { %v69_v10 = vpop.permute.xlu0 %68  ;;  %v229_v11 = vpop.permute.xlu1 %228 }
  0x79   :  { %v72_v12 = vsel %vm70_vm1, %v67_v8, %v69_v10 }
  0x7a   :  { %109 = vmatprep.subr.mxu0 %v72_v12 }
  0x7b   :  { %110 = vmatpush1.msra.mxu0 %v71_v14 }
  0x7c   :  { %v231_v15 = vpop.permute.xlu0 %230  ;;  %v227_v16 = vpop.permute.xlu1 %226  ;;  %4904 = vmatmul.mubr.msk.f32.vlgmr.msra.gmra.mxu0 %vm75_vm0, %v5168_v13 }
  0x7d   :  { %v233_v17 = vsel %vm232_vm2, %v227_v16, %v229_v11  ;;  %v234_v18 = vsel %vm232_vm2, %v229_v11, %v231_v15  ;;  %304 = vmatprep.mubr.f32.mxu0 %v5902_v3 }
  0x7e   :  { %270 = vmatprep.subr.mxu0 %v234_v18  ;;  %v22_v18 = vlaneseq }
  0x7f   :  { %271 = vmatpush1.msra.mxu0 %v233_v17 }
  0x80   :  { %v318_v20 = vpop.permute.xlu0 %317  ;;  %v320_v21 = vpop.permute.xlu1 %319  ;;  %4907 = vmatmul.mubr.msk.f32.vlgmr.msra.gmra.mxu0 %vm75_vm0, %v5179_v19 }
  0x81   :  { %v323_v22 = vsel %vm321_vm3, %v318_v20, %v320_v21  ;;  %482 = vmatprep.mubr.f32.mxu0 %v5902_v3 }
  0x82   :  { %359 = vmatprep.subr.mxu1 %v323_v22 }
  0x84   :  { %v316_v23 = vpop.permute.xlu0 %315  ;;  %v407_v24 = vpop.permute.xlu1 %406 }
  0x85   :  { %v322_v26 = vsel %vm321_vm3, %v316_v23, %v318_v20 }
  0x86   :  { %360 = vmatpush1.msra.mxu1 %v322_v26 }
  0x87   :  { %4909 = vmatmul.mubr.msk.f32.vlgmr.msra.gmra.mxu1 %vm75_vm0, %v5188_v25 }
  0x88   :  { %v409_v27 = vpop.permute.xlu0 %408  ;;  %v405_v28 = vpop.permute.xlu1 %404  ;;  %571 = vmatprep.mubr.f32.mxu1 %v5902_v3 }
  0x89   :  { %v411_v29 = vsel %vm410_vm4, %v405_v28, %v407_v24  ;;  %v412_v30 = vsel %vm410_vm4, %v407_v24, %v409_v27  ;;  %v23_v24 = vand.u32 127, %v22_v18 }
  0x8a   :  { %448 = vmatprep.subr.mxu0 %v412_v30 }
  0x8b   :  { %449 = vmatpush1.msra.mxu0 %v411_v29 }
  0x8c   :  { %v496_v32 = vpop.permute.xlu0 %495  ;;  %v498_v33 = vpop.permute.xlu1 %497  ;;  %4911 = vmatmul.mubr.msk.f32.vlgmr.msra.gmra.mxu0 %vm75_vm0, %v5199_v31 }
  0x8d   :  { %v501_v34 = vsel %vm499_vm5, %v496_v32, %v498_v33  ;;  %660 = vmatprep.mubr.f32.mxu0 %v5902_v3 }
  0x8e   :  { %537 = vmatprep.subr.mxu1 %v501_v34  ;;  %v29_v34 = vand.u32 15, %v23_v24 }
  0x90   :  { %v494_v35 = vpop.permute.xlu0 %493  ;;  %v585_v36 = vpop.permute.xlu1 %584  ;;  %vm5256_vm9 = vcmp.lt.s32.totalorder %v29_v34, 14 }
  0x91   :  { %v500_v38 = vsel %vm499_vm5, %v494_v35, %v496_v32 }
  0x92   :  { %538 = vmatpush1.msra.mxu1 %v500_v38 }
  0x93   :  { %4913 = vmatmul.mubr.msk.f32.vlgmr.msra.gmra.mxu1 %vm75_vm0, %v5208_v37 }
  0x94   :  { %v587_v39 = vpop.permute.xlu0 %586  ;;  %v583_v40 = vpop.permute.xlu1 %582  ;;  %749 = vmatprep.mubr.f32.mxu1 %v5902_v3 }
  0x95   :  { %v589_v41 = vsel %vm588_vm6, %v583_v40, %v585_v36  ;;  %v590_v42 = vsel %vm588_vm6, %v585_v36, %v587_v39 }
  0x96   :  { %626 = vmatprep.subr.mxu0 %v590_v42  ;;  %v24_v42 = vadd.s32 128, %v23_v24 }
  0x97   :  { %627 = vmatpush1.msra.mxu0 %v589_v41 }
  0x98   :  { %v674_v44 = vpop.permute.xlu0 %673  ;;  %v676_v45 = vpop.permute.xlu1 %675  ;;  %4915 = vmatmul.mubr.msk.f32.vlgmr.msra.gmra.mxu0 %vm75_vm0, %v5219_v43  ;;  %vm52_vm11 = vcmp.lt.s32.totalorder %v24_v42, 224 }
  0x99   :  { %v679_v46 = vsel %vm677_vm7, %v674_v44, %v676_v45  ;;  %838 = vmatprep.mubr.f32.mxu0 %v5902_v3 }
  0x9a   :  { %715 = vmatprep.subr.mxu1 %v679_v46 }
  0x9c   :  { %v672_v47 = vpop.permute.xlu0 %671  ;;  %v763_v48 = vpop.permute.xlu1 %762 }
  0x9d   :  { %v678_v50 = vsel %vm677_vm7, %v672_v47, %v674_v44  ;;  %v36_v47 = vand.u32 15, %v24_v42 }
  0x9e   :  { %716 = vmatpush1.msra.mxu1 %v678_v50 }
  0x9f   :  { %4917 = vmatmul.mubr.msk.f32.vlgmr.msra.gmra.mxu1 %vm75_vm0, %v5228_v49  ;;  %vm50_vm10 = vcmp.lt.s32.totalorder %v36_v47, 14 }
  0xa0   :  { %v765_v51 = vpop.permute.xlu0 %764  ;;  %v761_v52 = vpop.permute.xlu1 %760  ;;  %958 = vmatprep.mubr.f32.mxu1 %v5902_v3  ;;  %vm5271_vm12 = vmand %vm50_vm10, %vm52_vm11  ;;  %vm1147_vm10 = vcmask 7168   ;;  %vm1403_vm11 = vcmask 924672  }
  0xa1   :  { %v767_v53 = vsel %vm766_vm8, %v761_v52, %v763_v48  ;;  %v768_v54 = vsel %vm766_vm8, %v763_v48, %v765_v51 }
  0xa2   :  { %804 = vmatprep.subr.mxu0 %v768_v54  ;;  %v5302_v54 = vld [vmem:[%s5900_s3 + $0x8] sm:$0xff] }
  0xa3   :  { %805 = vmatpush1.msra.mxu0 %v767_v53  ;;  %v5297_v53 = vld [vmem:[%s5899_s2 + $0x8] sm:$0xff] }
  0xa4   :  { %4919 = vmatmul.mubr.msk.f32.vlgmr.msra.gmra.mxu0 %vm75_vm0, %v5239_v55 }
  0xa5   :  { %1043 = vmatprep.mubr.f32.mxu0 %v5902_v3 }
  0xad   :  { %v853_v33 = vpop.permute.xlu0 %852  ;;  %v861_v38 = vpop.permute.xlu1 %860 }
  0xc5   :  { %v219_v58 = vpop.f32.mrf.mxu1 }
  0xc7   :  { %v221_v60 = vpop.f32.mrf.mxu1 }
 0x13c   :  { %v145_v56 = vpop.f32.mrf.mxu0 }
 0x13d   :  { %v220_v59 = vadd.f32 %v219_v58, %v145_v56  ;;  %v966_v56 = vpop.permute.xlu0 %965 }
 0x13e   :  { %v147_v57 = vpop.f32.mrf.mxu0 }
 0x13f   :  { %v222_v62 = vadd.f32 %v221_v60, %v147_v57  ;;  %v881_v57 = vpop.permute.xlu1 %880 }
 0x140   :  { %v306_v61 = vpop.f32.mrf.mxu0 }
 0x141   :  { %v311_v63 = vadd.f32 %v306_v61, %v220_v59  ;;  %v1142_v58 = vpop.permute.xlu0 %1141 }
 0x142   :  { %v308_v0 = vpop.f32.mrf.mxu0 }
 0x143   :  { %v312_v2 = vadd.f32 %v308_v0, %v222_v62  ;;  %v1053_v59 = vpop.permute.xlu1 %1052 }
 0x145   :  { %v1314_v60 = vpop.permute.xlu0 %1313 }
 0x147   :  { %v395_v1 = vpop.f32.mrf.mxu1  ;;  %v1402_v61 = vpop.permute.xlu1 %1401 }
 0x148   :  { %v400_v4 = vadd.f32 %v395_v1, %v311_v63 }
 0x149   :  { %v397_v5 = vpop.f32.mrf.mxu1 }
 0x14a   :  { %v401_v9 = vadd.f32 %v397_v5, %v312_v2 }
 0x14c   :  { %v484_v8 = vpop.f32.mrf.mxu0 }
 0x14d   :  { %v489_v10 = vadd.f32 %v484_v8, %v400_v4 }
 0x14e   :  { %v486_v11 = vpop.f32.mrf.mxu0 }
 0x14f   :  { %v490_v14 = vadd.f32 %v486_v11, %v401_v9  ;;  %v5327_v11 = vld [vmem:[%s5898_s1 + $0x50] sm:$0xff] }
 0x153   :  { %v573_v12 = vpop.f32.mrf.mxu1 }
 0x154   :  { %v578_v15 = vadd.f32 %v573_v12, %v489_v10  ;;  %v5332_v12 = vld [vmem:[%s5898_s1 + $0x48] sm:$0xff] }
 0x155   :  { %v575_v16 = vpop.f32.mrf.mxu1 }
 0x156   :  { %v579_v20 = vadd.f32 %v575_v16, %v490_v14 }
 0x158   :  { %v662_v17 = vpop.f32.mrf.mxu0 }
 0x159   :  { %v667_v21 = vadd.f32 %v662_v17, %v578_v15 }
 0x15a   :  { %v664_v22 = vpop.f32.mrf.mxu0 }
 0x15b   :  { %v668_v26 = vadd.f32 %v664_v22, %v579_v20  ;;  %v5345_v20 = vld [vmem:[%s5898_s1 + $0x58] sm:$0xff] }
 0x15f   :  { %v751_v23 = vpop.f32.mrf.mxu1 }
 0x160   :  { %v756_v27 = vadd.f32 %v751_v23, %v667_v21 }
 0x161   :  { %v753_v28 = vpop.f32.mrf.mxu1 }
 0x162   :  { %v757_v35 = vadd.f32 %v753_v28, %v668_v26  ;;  %v5361_v26 = vld [vmem:[%s5898_s1 + $0x60] sm:$0xff] }
 0x164   :  { %v840_v29 = vpop.f32.mrf.mxu0 }
 0x165   :  { %v845_v30 = vadd.f32 %v840_v29, %v756_v27  ;;  %v5367_v27 = vld [vmem:[%s5898_s1 + $0x68] sm:$0xff] }
 0x166   :  { %v842_v32 = vpop.f32.mrf.mxu0 }
 0x167   :  { %v847_v36 = vmax.f32 %v845_v30, 0.0  ;;  %v846_v39 = vadd.f32 %v842_v32, %v757_v35 }
 0x169   :  { %v855_v40 = vmul.f32 %v853_v33, %v847_v36  ;;  %v848_v45 = vmax.f32 %v846_v39, 0.0  ;;  %v5382_v36 = vld [vmem:[%s5898_s1 + $0x70] sm:$0xff] }
 0x16b   :  { %v5260_v44 = vadd.f32 %v861_v38, %v855_v40  ;;  %v856_v48 = vmul.f32 %v853_v33, %v848_v45  ;;  %v5400_v45 = vld [vmem:[%s5898_s1 + $0x80] sm:$0xff] }
 0x16d   :  { %v865_v46 = vsel %vm5256_vm9, %v5260_v44, 0.0  ;;  %v5269_v50 = vadd.f32 %v861_v38, %v856_v48  ;;  %v5387_v38 = vld [vmem:[%s5898_s1 + $0x78] sm:$0xff] }
 0x16e   :  { %967 = vrot.lane.b32.xlu0 %v865_v46, %s5080_s7  ;;  %882 = vrot.lane.b32.xlu1 %v865_v46, %s5081_s8 }
 0x16f   :  { %v866_v52 = vsel %vm5271_vm12, %v5269_v50, 0.0 }
 0x172   :  { %1143 = vrot.lane.b32.xlu0 %v865_v46, %s5082_s9  ;;  %1054 = vrot.lane.b32.xlu1 %v865_v46, %s5083_s10 }
 0x176   :  { %1397 = vrot.lane.b32.xlu0 %v865_v46, %s5084_s11  ;;  %1309 = vrot.lane.b32.xlu1 %v865_v46, %s5070_s19 }
 0x17a   :  { %969 = vrot.lane.b32.xlu1 %v866_v52, %s5080_s7  ;;  %884 = vrot.lane.b32.xlu0 %v866_v52, %s5081_s8 }
 0x17e   :  { %1486 = vrot.lane.b32.xlu1 %v865_v46, %s5073_s25  ;;  %1056 = vrot.lane.b32.xlu0 %v866_v52, %s5083_s10 }
 0x182   :  { %1145 = vrot.lane.b32.xlu1 %v866_v52, %s5082_s9  ;;  %1490 = vrot.lane.b32.xlu0 %v5902_v3, %s5073_s25 }
 0x186   :  { %1311 = vrot.lane.b32.xlu1 %v866_v52, %s5070_s19  ;;  %1399 = vrot.lane.b32.xlu0 %v866_v52, %s5084_s11 }
 0x18a   :  { %1488 = vrot.lane.b32.xlu1 %v866_v52, %s5073_s25  ;;  %1576 = vrot.lane.b32.xlu0 %v866_v52, %s5074_s26  ;;  %v5410_v52 = vld [vmem:[%s5898_s1 + $0x88] sm:$0xff] }
 0x18b   :  { %5909 = vst [vmem:[#allocation6_spill] sm:$0xff] %v5410_v52 }
 0x18e   :  { %1578 = vrot.lane.b32.xlu1 %v5902_v3, %s5074_s26  ;;  %1574 = vrot.lane.b32.xlu0 %v865_v46, %s5074_s26 }
 0x192   :  { %1666 = vperm.xlu1 %5046, %v5297_v53   ;;  %1675 = vperm.xlu0 %5045, %v5302_v54  }
 0x196   :  { %1695 = vrot.lane.b32.xlu1 %v5902_v3, %s5081_s8  ;;  %1779 = vrot.lane.b32.xlu0 %v5902_v3, %s5080_s7 }
 0x19a   :  { %1865 = vrot.lane.b32.xlu1 %v5902_v3, %s5083_s10  ;;  %1953 = vrot.lane.b32.xlu0 %v5902_v3, %s5082_s9 }
 0x19e   :  { %2212 = vrot.lane.b32.xlu1 %v5902_v3, %s5084_s11  ;;  %2124 = vrot.lane.b32.xlu0 %v5902_v3, %s5070_s19 }
 0x1a2   :  { %2388 = vrot.lane.b32.xlu1 %v5902_v3, %s5074_s26  ;;  %2300 = vrot.lane.b32.xlu0 %v5902_v3, %s5073_s25 }
 0x1e0   :  { %v968_v62 = vpop.permute.xlu0 %967  ;;  %v883_v63 = vpop.permute.xlu1 %882 }
 0x1e1   :  { %v887_v14 = vsel %vm886_vm13, %v881_v57, %v883_v63  ;;  %v972_v15 = vsel %vm971_vm14, %v966_v56, %v968_v62  ;;  %v5419_v56 = vld [vmem:[%s5897_s0 + $0x20] sm:$0xff]  ;;  %v5426_v57 = vld [vmem:[%s5897_s0 + $0x28] sm:$0xff] }
 0x1e2   :  { %2503 = vrot.lane.b32.xlu1 %v5419_v56, %s5070_s19  ;;  %2505 = vrot.lane.b32.xlu0 %v5426_v57, %s5070_s19 }
 0x1e4   :  { %v1144_v0 = vpop.permute.xlu0 %1143  ;;  %v1055_v1 = vpop.permute.xlu1 %1054 }
 0x1e5   :  { %v1059_v21 = vsel %vm1058_vm15, %v1053_v59, %v1055_v1  ;;  %v1148_v28 = vsel %vm1147_vm10, %v1142_v58, %v1144_v0  ;;  %v5433_v58 = vld [vmem:[%s5897_s0 + $0x18] sm:$0xff] }
 0x1e6   :  { %2501 = vrot.lane.b32.xlu1 %v5433_v58, %s5070_s19  ;;  %2662 = vrot.lane.b32.xlu0 %v5419_v56, %s5072_s24 }
 0x1e8   :  { %v1398_v2 = vpop.permute.xlu0 %1397  ;;  %v1310_v4 = vpop.permute.xlu1 %1309 }
 0x1ea   :  { %2664 = vrot.lane.b32.xlu1 %v5426_v57, %s5072_s24  ;;  %2660 = vrot.lane.b32.xlu0 %v5433_v58, %s5072_s24 }
 0x1ec   :  { %v970_v5 = vpop.permute.xlu1 %969  ;;  %v885_v8 = vpop.permute.xlu0 %884 }
 0x1ed   :  { %v888_v9 = vsel %vm886_vm13, %v883_v63, %v885_v8  ;;  %v973_v10 = vsel %vm971_vm14, %v968_v62, %v970_v5 }
 0x1ee   :  { %924 = vmatprep.subr.mxu1 %v888_v9  ;;  %1009 = vmatprep.subr.mxu0 %v973_v10 }
 0x1ef   :  { %925 = vmatpush1.msra.mxu1 %v887_v14  ;;  %1010 = vmatpush1.msra.mxu0 %v972_v15 }
 0x1f0   :  { %v1487_v16 = vpop.permute.xlu1 %1486  ;;  %4922 = vmatmul.mubr.msk.f32.vlgmr.msra.gmra.mxu1 %vm75_vm0, %v5327_v11  ;;  %v1057_v17 = vpop.permute.xlu0 %1056  ;;  %4923 = vmatmul.mubr.msk.f32.vlgmr.msra.gmra.mxu0 %vm75_vm0, %v5332_v12 }
 0x1f1   :  { %v1060_v18 = vsel %vm1058_vm15, %v1055_v1, %v1057_v17  ;;  %1130 = vmatprep.mubr.f32.mxu1 %v5902_v3  ;;  %1219 = vmatprep.mubr.f32.mxu0 %v5902_v3 }
 0x1f2   :  { %1096 = vmatprep.subr.mxu1 %v1060_v18  ;;  %2749 = vrot.lane.b32.xlu1 %v5419_v56, %s5073_s25 }
 0x1f3   :  { %1097 = vmatpush1.msra.mxu1 %v1059_v21  ;;  %2751 = vrot.lane.b32.xlu0 %v5426_v57, %s5073_s25 }
 0x1f4   :  { %v1146_v22 = vpop.permute.xlu1 %1145  ;;  %4925 = vmatmul.mubr.msk.f32.vlgmr.msra.gmra.mxu1 %vm75_vm0, %v5345_v20  ;;  %5020 = vmatprep.subr.msk.mxu1 %vm5271_vm12, %v5269_v50  ;;  %v1491_v23 = vpop.permute.xlu0 %1490 }
 0x1f5   :  { %5021 = vmatpush1.msk.msra.mxu1 %vm5256_vm9, %v5260_v44  ;;  %v1149_v24 = vsel %vm1147_vm10, %v1144_v0, %v1146_v22  ;;  %1297 = vmatprep.mubr.f32.mxu1 %v5902_v3 }
 0x1f6   :  { %1185 = vmatprep.subr.mxu0 %v1149_v24  ;;  %2747 = vrot.lane.b32.xlu1 %v5433_v58, %s5073_s25 }
 0x1f7   :  { %1186 = vmatpush1.msra.mxu0 %v1148_v28  ;;  %2836 = vrot.lane.b32.xlu0 %v5419_v56, %s5074_s26 }
 0x1f8   :  { %4927 = vmatmul.mubr.msk.f32.vlgmr.msra.gmra.mxu0 %vm75_vm0, %v5361_v26  ;;  %v1312_v29 = vpop.permute.xlu1 %1311  ;;  %v1400_v30 = vpop.permute.xlu0 %1399  ;;  %4929 = vmatmul.mubr.msk.f32.vlgmr.msra.gmra.mxu1 %vm75_vm0, %v5367_v27 }
 0x1f9   :  { %v1316_v32 = vsel %vm70_vm1, %v1312_v29, %v1314_v60  ;;  %v1405_v33 = vsel %vm1403_vm11, %v1400_v30, %v1402_v61  ;;  %v1315_v34 = vsel %vm70_vm1, %v1310_v4, %v1312_v29  ;;  %1386 = vmatprep.mubr.f32.mxu0 %v5902_v3  ;;  %v1404_v35 = vsel %vm1403_vm11, %v1398_v2, %v1400_v30 }
 0x1fa   :  { %1352 = vmatprep.subr.mxu0 %v1316_v32  ;;  %1441 = vmatprep.subr.mxu1 %v1405_v33 }
 0x1fb   :  { %1353 = vmatpush1.msra.mxu0 %v1315_v34  ;;  %1442 = vmatpush1.msra.mxu1 %v1404_v35 }
 0x1fc   :  { %4931 = vmatmul.mubr.msk.f32.vlgmr.msra.gmra.mxu0 %vm75_vm0, %v5382_v36  ;;  %v1489_v39 = vpop.permute.xlu1 %1488  ;;  %v1577_v40 = vpop.permute.xlu0 %1576  ;;  %1475 = vmatprep.mubr.f32.mxu1 %v5902_v3 }
 0x1fd   :  { %4933 = vmatmul.mubr.msk.f32.vlgmr.msra.gmra.mxu1 %vm75_vm0, %v5387_v38  ;;  %v1493_v42 = vsel %vm321_vm3, %v1489_v39, %v1491_v23  ;;  %v1492_v44 = vsel %vm321_vm3, %v1487_v16, %v1489_v39  ;;  %1563 = vmatprep.mubr.f32.mxu0 %v5902_v3 }
 0x1fe   :  { %1529 = vmatprep.subr.mxu0 %v1493_v42  ;;  %1651 = vmatprep.mubr.f32.mxu1 %v5902_v3 }
 0x1ff   :  { %1530 = vmatpush1.msra.mxu0 %v1492_v44  ;;  %2838 = vrot.lane.b32.xlu1 %v5426_v57, %s5074_s26 }
 0x200   :  { %v1579_v46 = vpop.permute.xlu1 %1578  ;;  %4935 = vmatmul.mubr.msk.f32.vlgmr.msra.gmra.mxu0 %vm75_vm0, %v5400_v45  ;;  %v1575_v47 = vpop.permute.xlu0 %1574  ;;  %2834 = vrot.lane.b32.xlu0 %v5433_v58, %s5074_s26 }
 0x201   :  { %v1580_v48 = vsel %vm410_vm4, %v1575_v47, %v1577_v40  ;;  %v1581_v50 = vsel %vm410_vm4, %v1577_v40, %v1579_v46  ;;  %1772 = vmatprep.mubr.f32.mxu0 %v5902_v3 }
 0x202   :  { %1617 = vmatprep.subr.mxu1 %v1581_v50 }
 0x203   :  { %1618 = vmatpush1.msra.mxu1 %v1580_v48  ;;  %2923 = vrot.lane.b32.xlu1 %v5419_v56, %s5075_s27 }
 0x204   :  { %4937 = vmatmul.mubr.msk.f32.vlgmr.msra.gmra.mxu1 %vm75_vm0, %v5410_v52  ;;  %v5910_v52 = vmov 0.0  }
 0x205   :  { %1856 = vmatprep.mubr.f32.mxu1 %v5902_v3 }
 0x20d   :  { %v1667_v42 = vpop.permute.xlu1 %1666  ;;  %v1676_v47 = vpop.permute.xlu0 %1675 }
 0x2b0   :  { %v960_v59 = vpop.f32.mrf.mxu1  ;;  %v1045_v60 = vpop.f32.mrf.mxu0 }
 0x2b1   :  { %v1046_v61 = vadd.f32 %v1045_v60, %v960_v59 }
 0x2b2   :  { %v962_v62 = vpop.f32.mrf.mxu1  ;;  %v1047_v63 = vpop.f32.mrf.mxu0 }
 0x2b3   :  { %v1048_v1 = vadd.f32 %v1047_v63, %v962_v62 }
 0x2b4   :  { %v1132_v0 = vpop.f32.mrf.mxu1 }
 0x2b5   :  { %v1137_v2 = vadd.f32 %v1132_v0, %v1046_v61 }
 0x2b6   :  { %v1134_v4 = vpop.f32.mrf.mxu1 }
 0x2b7   :  { %v1138_v9 = vadd.f32 %v1134_v4, %v1048_v1 }
 0x2b8   :  { %v1221_v5 = vpop.f32.mrf.mxu0  ;;  %v1299_v8 = vpop.f32.mrf.mxu1 }
 0x2b9   :  { %v1226_v10 = vadd.f32 %v1221_v5, %v1137_v2  ;;  %v1696_v2 = vpop.permute.xlu1 %1695  ;;  %v1780_v5 = vpop.permute.xlu0 %1779 }
 0x2ba   :  { %v1223_v14 = vpop.f32.mrf.mxu0  ;;  %v1301_v15 = vpop.f32.mrf.mxu1 }
 0x2bb   :  { %v1227_v16 = vadd.f32 %v1223_v14, %v1138_v9  ;;  %v1304_v17 = vadd.f32 %v1299_v8, %v1226_v10 }
 0x2bc   :  { %v1388_v18 = vpop.f32.mrf.mxu0 }
 0x2bd   :  { %v1393_v21 = vadd.f32 %v1388_v18, %v1304_v17  ;;  %v1477_v22 = vpop.f32.mrf.mxu1  ;;  %v1305_v24 = vadd.f32 %v1301_v15, %v1227_v16  ;;  %v1866_v4 = vpop.permute.xlu1 %1865 }
 0x2be   :  { %v1390_v23 = vpop.f32.mrf.mxu0 }
 0x2bf   :  { %v1482_v28 = vadd.f32 %v1477_v22, %v1393_v21  ;;  %v1479_v30 = vpop.f32.mrf.mxu1  ;;  %v1394_v32 = vadd.f32 %v1390_v23, %v1305_v24 }
 0x2c0   :  { %v1565_v29 = vpop.f32.mrf.mxu0 }
 0x2c1   :  { %v1570_v33 = vadd.f32 %v1565_v29, %v1482_v28  ;;  %v1483_v39 = vadd.f32 %v1479_v30, %v1394_v32  ;;  %v5509_v8 = vpop.permute.xlu1 %2212 }
 0x2c2   :  { %v1567_v44 = vpop.f32.mrf.mxu0 }
 0x2c3   :  { %v1571_v50 = vadd.f32 %v1567_v44, %v1483_v39 }
 0x2c4   :  { %v1653_v34 = vpop.f32.mrf.mxu1 }
 0x2c5   :  { %v1658_v35 = vadd.f32 %v1653_v34, %v1570_v33 }
 0x2c6   :  { %v1655_v48 = vpop.f32.mrf.mxu1 }
 0x2c7   :  { %v1660_v40 = vmax.f32 %v1658_v35, 0.0  ;;  %v1659_v61 = vadd.f32 %v1655_v48, %v1571_v50 }
 0x2c9   :  { %v1669_v46 = vmul.f32 %v1667_v42, %v1660_v40  ;;  %v1661_v62 = vmax.f32 %v1659_v61, 0.0  ;;  %v5563_v61 = vld [vmem:[%s5898_s1 + $0x90] sm:$0xff] }
 0x2cb   :  { %v5457_v59 = vadd.f32 %v1676_v47, %v1669_v46  ;;  %v1670_v63 = vmul.f32 %v1667_v42, %v1661_v62 }
 0x2cd   :  { %v1680_v60 = vsel %vm5256_vm9, %v5457_v59, 0.0  ;;  %v5468_v0 = vadd.f32 %v1676_v47, %v1670_v63 }
 0x2ce   :  { %1781 = vrot.lane.b32.xlu0 %v1680_v60, %s5080_s7  ;;  %1697 = vrot.lane.b32.xlu1 %v1680_v60, %s5081_s8 }
 0x2cf   :  { %v1681_v1 = vsel %vm5271_vm12, %v5468_v0, 0.0 }
 0x2d2   :  { %1955 = vrot.lane.b32.xlu0 %v1680_v60, %s5082_s9  ;;  %1867 = vrot.lane.b32.xlu1 %v1680_v60, %s5083_s10 }
 0x2d6   :  { %2208 = vrot.lane.b32.xlu0 %v1680_v60, %s5084_s11  ;;  %2120 = vrot.lane.b32.xlu1 %v1680_v60, %s5070_s19 }
 0x2da   :  { %2384 = vrot.lane.b32.xlu0 %v1680_v60, %s5074_s26  ;;  %2296 = vrot.lane.b32.xlu1 %v1680_v60, %s5073_s25  ;;  %v5558_v60 = vld [vmem:[%s5898_s1 + $0x98] sm:$0xff] }
 0x2de   :  { %1699 = vrot.lane.b32.xlu0 %v1681_v1, %s5081_s8  ;;  %1783 = vrot.lane.b32.xlu1 %v1681_v1, %s5080_s7 }
 0x2e2   :  { %1869 = vrot.lane.b32.xlu0 %v1681_v1, %s5083_s10  ;;  %1957 = vrot.lane.b32.xlu1 %v1681_v1, %s5082_s9 }
 0x2e6   :  { %2925 = vrot.lane.b32.xlu0 %v5426_v57, %s5075_s27  ;;  %2122 = vrot.lane.b32.xlu1 %v1681_v1, %s5070_s19 }
 0x2ea   :  { %2210 = vrot.lane.b32.xlu0 %v1681_v1, %s5084_s11  ;;  %2298 = vrot.lane.b32.xlu1 %v1681_v1, %s5073_s25 }
 0x2ee   :  { %2386 = vrot.lane.b32.xlu0 %v1681_v1, %s5074_s26  ;;  %2921 = vrot.lane.b32.xlu1 %v5433_v58, %s5075_s27 }
 0x2f2   :  { %3010 = vrot.lane.b32.xlu0 %v5419_v56, %s5076_s28  ;;  %3012 = vrot.lane.b32.xlu1 %v5426_v57, %s5076_s28 }
 0x2f6   :  { %3008 = vrot.lane.b32.xlu0 %v5433_v58, %s5076_s28  ;;  %3097 = vrot.lane.b32.xlu1 %v5419_v56, %s5078_s29 }
 0x2fa   :  { %3099 = vrot.lane.b32.xlu0 %v5426_v57, %s5078_s29  ;;  %3095 = vrot.lane.b32.xlu1 %v5433_v58, %s5078_s29 }
 0x2fe   :  { %3184 = vrot.lane.b32.xlu0 %v5419_v56, %s5079_s30  ;;  %3186 = vrot.lane.b32.xlu1 %v5426_v57, %s5079_s30  ;;  %v1954_v57 = vpop.permute.xlu0 %1953 }
 0x302   :  { %3182 = vrot.lane.b32.xlu0 %v5433_v58, %s5079_s30  ;;  %3273 = vperm.xlu1 %5046, %v5155_v6   ;;  %v5519_v6 = vpop.permute.xlu1 %2388 }
 0x306   :  { %3281 = vperm.xlu0 %5045, %v5160_v7   ;;  %3299 = vrot.lane.b32.xlu1 %v5902_v3, %s5081_s8  ;;  %v2125_v7 = vpop.permute.xlu0 %2124  ;;  %v5523_v9 = vpop.permute.xlu1 %2503 }
 0x30a   :  { %3383 = vrot.lane.b32.xlu0 %v5902_v3, %s5080_s7  ;;  %3468 = vrot.lane.b32.xlu1 %v5902_v3, %s5083_s10  ;;  %v5525_v10 = vpop.permute.xlu0 %2300  ;;  %v5527_v14 = vpop.permute.xlu1 %2501 }
 0x30e   :  { %3555 = vrot.lane.b32.xlu0 %v5902_v3, %s5082_s9  ;;  %3811 = vrot.lane.b32.xlu1 %v5902_v3, %s5084_s11  ;;  %v5529_v15 = vpop.permute.xlu0 %2505  ;;  %v5531_v16 = vpop.permute.xlu1 %2664 }
 0x312   :  { %3724 = vrot.lane.b32.xlu0 %v5902_v3, %s5070_s19  ;;  %v5533_v17 = vpop.permute.xlu0 %2662  ;;  %v5535_v18 = vpop.permute.xlu1 %2749 }
 0x316   :  { %v5537_v21 = vpop.permute.xlu0 %2660  ;;  %v5539_v22 = vpop.permute.xlu1 %2747 }
 0x31a   :  { %v5541_v23 = vpop.permute.xlu0 %2751  ;;  %v5543_v24 = vpop.permute.xlu1 %2838 }
 0x31e   :  { %v5545_v28 = vpop.permute.xlu0 %2836  ;;  %v5547_v29 = vpop.permute.xlu1 %2923 }
 0x322   :  { %v5549_v30 = vpop.permute.xlu0 %2834 }
 0x340   :  { %v1698_v32 = vpop.permute.xlu1 %1697  ;;  %v1782_v33 = vpop.permute.xlu0 %1781 }
 0x341   :  { %v1701_v62 = vsel %vm886_vm13, %v1696_v2, %v1698_v32  ;;  %v1785_v63 = vsel %vm971_vm14, %v1780_v5, %v1782_v33  ;;  %v5578_v2 = vld [vmem:[%s5898_s1 + $0xa0] sm:$0xff]  ;;  %v5583_v5 = vld [vmem:[%s5898_s1 + $0xa8] sm:$0xff] }
 0x344   :  { %v1868_v34 = vpop.permute.xlu1 %1867  ;;  %v1956_v35 = vpop.permute.xlu0 %1955 }
 0x348   :  { %v2121_v39 = vpop.permute.xlu1 %2120  ;;  %v2209_v40 = vpop.permute.xlu0 %2208 }
 0x34c   :  { %v2297_v42 = vpop.permute.xlu1 %2296  ;;  %v5551_v44 = vpop.permute.xlu0 %2384 }
 0x350   :  { %v1784_v46 = vpop.permute.xlu1 %1783  ;;  %v1700_v47 = vpop.permute.xlu0 %1699 }
 0x351   :  { %v1702_v48 = vsel %vm886_vm13, %v1698_v32, %v1700_v47  ;;  %v1786_v50 = vsel %vm971_vm14, %v1782_v33, %v1784_v46  ;;  %v1871_v32 = vsel %vm1058_vm15, %v1866_v4, %v1868_v34  ;;  %v1959_v33 = vsel %vm1147_vm10, %v1954_v57, %v1956_v35  ;;  %v5607_v57 = vld [vmem:[%s5898_s1 + $0xb8] sm:$0xff] }
 0x352   :  { %1738 = vmatprep.subr.mxu0 %v1702_v48  ;;  %1822 = vmatprep.subr.mxu1 %v1786_v50 }
 0x353   :  { %1739 = vmatpush1.msra.mxu0 %v1701_v62  ;;  %1823 = vmatpush1.msra.mxu1 %v1785_v63  ;;  %v5627_v63 = vld [vmem:[%s5898_s1 + $0xc0] sm:$0xff] }
 0x354   :  { %v1958_v1 = vpop.permute.xlu1 %1957  ;;  %4942 = vmatmul.mubr.msk.f32.vlgmr.msra.gmra.mxu0 %vm75_vm0, %v5558_v60  ;;  %4943 = vmatmul.mubr.msk.f32.vlgmr.msra.gmra.mxu1 %vm75_vm0, %v5563_v61  ;;  %v1870_v46 = vpop.permute.xlu0 %1869 }
 0x355   :  { %v1872_v47 = vsel %vm1058_vm15, %v1868_v34, %v1870_v46  ;;  %v1960_v3 = vsel %vm1147_vm10, %v1956_v35, %v1958_v1  ;;  %1942 = vmatprep.mubr.f32.mxu0 %v5910_v52  ;;  %2030 = vmatprep.mubr.f32.mxu1 %v5910_v52  ;;  %v2507_v1 = vsel %vm70_vm1, %v5527_v14, %v5523_v9 }
 0x356   :  { %1908 = vmatprep.subr.mxu0 %v1872_v47  ;;  %1996 = vmatprep.subr.mxu1 %v1960_v3  ;;  %v5602_v3 = vld [vmem:[%s5898_s1 + $0xb0] sm:$0xff] }
 0x357   :  { %1909 = vmatpush1.msra.mxu0 %v1871_v32  ;;  %1997 = vmatpush1.msra.mxu1 %v1959_v33 }
 0x358   :  { %v2123_v48 = vpop.permute.xlu1 %2122  ;;  %4945 = vmatmul.mubr.msk.f32.vlgmr.msra.gmra.mxu0 %vm75_vm0, %v5578_v2  ;;  %4947 = vmatmul.mubr.msk.f32.vlgmr.msra.gmra.mxu1 %vm75_vm0, %v5583_v5  ;;  %v5591_v50 = vpop.permute.xlu0 %2925 }
 0x359   :  { %v2126_v62 = vsel %vm70_vm1, %v2121_v39, %v2123_v48  ;;  %5022 = vmatprep.subr.msk.mxu0 %vm5271_vm12, %v5468_v0  ;;  %v2127_v4 = vsel %vm70_vm1, %v2123_v48, %v2125_v7  ;;  %2108 = vmatprep.mubr.f32.mxu0 %v5910_v52 }
 0x35a   :  { %5023 = vmatpush1.msk.msra.mxu0 %vm5256_vm9, %v5457_v59  ;;  %2163 = vmatprep.subr.mxu1 %v2127_v4 }
 0x35b   :  { %2164 = vmatpush1.msra.mxu1 %v2126_v62  ;;  %2197 = vmatprep.mubr.f32.mxu1 %v5910_v52 }
 0x35c   :  { %v2299_v0 = vpop.permute.xlu1 %2298  ;;  %4949 = vmatmul.mubr.msk.f32.vlgmr.msra.gmra.mxu0 %vm75_vm0, %v5602_v3  ;;  %4951 = vmatmul.mubr.msk.f32.vlgmr.msra.gmra.mxu1 %vm75_vm0, %v5607_v57  ;;  %v2211_v7 = vpop.permute.xlu0 %2210 }
 0x35d   :  { %v2302_v34 = vsel %vm321_vm3, %v2297_v42, %v2299_v0  ;;  %v2214_v35 = vsel %vm1403_vm11, %v2209_v40, %v2211_v7  ;;  %v2215_v39 = vsel %vm1403_vm11, %v2211_v7, %v5509_v8  ;;  %v2303_v59 = vsel %vm321_vm3, %v2299_v0, %v5525_v10  ;;  %2285 = vmatprep.mubr.f32.mxu0 %v5910_v52  ;;  %v5632_v42 = vld [vmem:[%s5898_s1 + $0xc8] sm:$0xff] }
 0x35e   :  { %2251 = vmatprep.subr.mxu0 %v2215_v39  ;;  %2339 = vmatprep.subr.mxu1 %v2303_v59  ;;  %v2508_v10 = vsel %vm70_vm1, %v5523_v9, %v5529_v15  ;;  %v2667_v15 = vsel %vm232_vm2, %v5533_v17, %v5531_v16  ;;  %v5655_v9 = vld [vmem:[%s5898_s1 + $0xd0] sm:$0xff]  ;;  %v2841_v16 = vsel %vm410_vm4, %v5545_v28, %v5543_v24 }
 0x35f   :  { %2252 = vmatpush1.msra.mxu0 %v2214_v35  ;;  %2340 = vmatpush1.msra.mxu1 %v2302_v34 }
 0x360   :  { %2373 = vmatprep.mubr.f32.mxu1 %v5910_v52  ;;  %v2922_v8 = vpop.permute.xlu1 %2921  ;;  %4953 = vmatmul.mubr.msk.f32.vlgmr.msra.gmra.mxu0 %vm75_vm0, %v5627_v63  ;;  %v2387_v40 = vpop.permute.xlu0 %2386 }
 0x361   :  { %4955 = vmatmul.mubr.msk.f32.vlgmr.msra.gmra.mxu1 %vm75_vm0, %v5632_v42  ;;  %2544 = vmatprep.subr.mxu1 %v2508_v10  ;;  %v2390_v46 = vsel %vm410_vm4, %v5551_v44, %v2387_v40  ;;  %v2391_v47 = vsel %vm410_vm4, %v2387_v40, %v5519_v6  ;;  %v2666_v6 = vsel %vm232_vm2, %v5537_v21, %v5533_v17 }
 0x362   :  { %2545 = vmatpush1.msra.mxu1 %v2507_v1  ;;  %2427 = vmatprep.subr.mxu0 %v2391_v47  ;;  %v2754_v17 = vsel %vm321_vm3, %v5535_v18, %v5541_v23 }
 0x363   :  { %2703 = vmatprep.subr.mxu1 %v2667_v15  ;;  %2428 = vmatpush1.msra.mxu0 %v2390_v46 }
 0x364   :  { %2461 = vmatprep.mubr.f32.mxu0 %v5910_v52  ;;  %2578 = vmatprep.mubr.f32.mxu1 %v5910_v52  ;;  %v3013_v14 = vpop.permute.xlu1 %3012  ;;  %v3011_v44 = vpop.permute.xlu0 %3010 }
 0x365   :  { %4957 = vmatmul.mubr.msk.f32.vlgmr.msra.gmra.mxu0 %vm75_vm0, %v5655_v9  ;;  %4964 = vmatmul.mubr.msk.f32.vlgmr.msra.gmra.mxu1 %vm75_vm0, %v5168_v13  ;;  %v2753_v13 = vsel %vm321_vm3, %v5539_v22, %v5535_v18  ;;  %v2928_v18 = vsel %vm499_vm5, %v5547_v29, %v5591_v50  ;;  %v3015_v22 = vsel %vm588_vm6, %v3011_v44, %v3013_v14 }
 0x366   :  { %2618 = vmatprep.subr.mxu0 %v5419_v56  ;;  %2704 = vmatpush1.msra.mxu1 %v2666_v6  ;;  %v5047_v56 = vld [vmem:[%s5898_s1] sm:$0xff] }
 0x367   :  { %2619 = vmatpush1.msra.mxu0 %v5433_v58  ;;  %2877 = vmatprep.subr.mxu1 %v2841_v16  ;;  %v2840_v58 = vsel %vm410_vm4, %v5549_v30, %v5545_v28  ;;  %v2927_v28 = vsel %vm499_vm5, %v2922_v8, %v5547_v29 }
 0x368   :  { %2790 = vmatprep.subr.mxu0 %v2754_v17  ;;  %2652 = vmatprep.mubr.f32.mxu0 %v5910_v52  ;;  %v3098_v21 = vpop.permute.xlu1 %3097  ;;  %v3009_v32 = vpop.permute.xlu0 %3008 }
 0x369   :  { %2737 = vmatprep.mubr.f32.mxu1 %v5910_v52  ;;  %4965 = vmatmul.mubr.msk.f32.vlgmr.msra.gmra.mxu0 %vm75_vm0, %v5047_v56  ;;  %v3014_v30 = vsel %vm588_vm6, %v3009_v32, %v3011_v44 }
 0x36a   :  { %4967 = vmatmul.mubr.msk.f32.vlgmr.msra.gmra.mxu1 %vm75_vm0, %v5179_v19  ;;  %2791 = vmatpush1.msra.mxu0 %v2753_v13 }
 0x36b   :  { %2878 = vmatpush1.msra.mxu1 %v2840_v58  ;;  %2964 = vmatprep.subr.mxu0 %v2928_v18 }
 0x36c   :  { %3051 = vmatprep.subr.mxu1 %v3015_v22  ;;  %2824 = vmatprep.mubr.f32.mxu0 %v5910_v52  ;;  %v3096_v23 = vpop.permute.xlu1 %3095  ;;  %v3100_v24 = vpop.permute.xlu0 %3099 }
 0x36d   :  { %2911 = vmatprep.mubr.f32.mxu1 %v5910_v52  ;;  %4969 = vmatmul.mubr.msk.f32.vlgmr.msra.gmra.mxu0 %vm75_vm0, %v5188_v25  ;;  %v3102_v19 = vsel %vm677_vm7, %v3098_v21, %v3100_v24  ;;  %v3101_v48 = vsel %vm677_vm7, %v3096_v23, %v3098_v21 }
 0x36e   :  { %4971 = vmatmul.mubr.msk.f32.vlgmr.msra.gmra.mxu1 %vm75_vm0, %v5199_v31  ;;  %2965 = vmatpush1.msra.mxu0 %v2927_v28 }
 0x36f   :  { %3052 = vmatpush1.msra.mxu1 %v3014_v30  ;;  %3138 = vmatprep.subr.mxu0 %v3102_v19 }
 0x370   :  { %2998 = vmatprep.mubr.f32.mxu0 %v5910_v52  ;;  %v3187_v33 = vpop.permute.xlu1 %3186  ;;  %3085 = vmatprep.mubr.f32.mxu1 %v5910_v52  ;;  %v3185_v29 = vpop.permute.xlu0 %3184 }
 0x371   :  { %4973 = vmatmul.mubr.msk.f32.vlgmr.msra.gmra.mxu0 %vm75_vm0, %v5208_v37  ;;  %v3189_v25 = vsel %vm766_vm8, %v3185_v29, %v3187_v33 }
 0x372   :  { %3139 = vmatpush1.msra.mxu0 %v3101_v48  ;;  %4975 = vmatmul.mubr.msk.f32.vlgmr.msra.gmra.mxu1 %vm75_vm0, %v5219_v43 }
 0x373   :  { %3225 = vmatprep.subr.mxu1 %v3189_v25  ;;  %3172 = vmatprep.mubr.f32.mxu0 %v5910_v52 }
 0x374   :  { %v3183_v31 = vpop.permute.xlu0 %3182  ;;  %3259 = vmatprep.mubr.f32.mxu1 %v5910_v52 }
 0x375   :  { %4977 = vmatmul.mubr.msk.f32.vlgmr.msra.gmra.mxu0 %vm75_vm0, %v5228_v49  ;;  %v3188_v50 = vsel %vm766_vm8, %v3183_v31, %v3185_v29 }
 0x376   :  { %3226 = vmatpush1.msra.mxu1 %v3188_v50  ;;  %3376 = vmatprep.mubr.f32.mxu0 %v5910_v52 }
 0x377   :  { %4979 = vmatmul.mubr.msk.f32.vlgmr.msra.gmra.mxu1 %vm75_vm0, %v5239_v55 }
 0x378   :  { %3460 = vmatprep.mubr.f32.mxu1 %v5910_v52 }
 0x414   :  { %v1774_v37 = vpop.f32.mrf.mxu0  ;;  %v1858_v43 = vpop.f32.mrf.mxu1 }
 0x415   :  { %v1859_v62 = vadd.f32 %v1858_v43, %v1774_v37 }
 0x416   :  { %v1776_v4 = vpop.f32.mrf.mxu0  ;;  %v1860_v0 = vpop.f32.mrf.mxu1 }
 0x417   :  { %v1861_v7 = vadd.f32 %v1860_v0, %v1776_v4 }
 0x418   :  { %v1944_v34 = vpop.f32.mrf.mxu0  ;;  %v2032_v35 = vpop.f32.mrf.mxu1 }
 0x419   :  { %v1949_v39 = vadd.f32 %v1944_v34, %v1859_v62 }
 0x41a   :  { %v1946_v49 = vpop.f32.mrf.mxu0  ;;  %v2034_v59 = vpop.f32.mrf.mxu1 }
 0x41b   :  { %v2037_v8 = vadd.f32 %v2032_v35, %v1949_v39  ;;  %v1950_v10 = vadd.f32 %v1946_v49, %v1861_v7 }
 0x41c   :  { %v2110_v40 = vpop.f32.mrf.mxu0  ;;  %v2199_v1 = vpop.f32.mrf.mxu1 }
 0x41d   :  { %v2038_v46 = vadd.f32 %v2034_v59, %v1950_v10  ;;  %v2115_v47 = vadd.f32 %v2110_v40, %v2037_v8 }
 0x41e   :  { %v2112_v55 = vpop.f32.mrf.mxu0  ;;  %v2201_v15 = vpop.f32.mrf.mxu1 }
 0x41f   :  { %v2204_v14 = vadd.f32 %v2199_v1, %v2115_v47  ;;  %v2116_v44 = vadd.f32 %v2112_v55, %v2038_v46 }
 0x420   :  { %v2287_v6 = vpop.f32.mrf.mxu0 }
 0x421   :  { %v2205_v16 = vadd.f32 %v2201_v15, %v2116_v44  ;;  %v2292_v17 = vadd.f32 %v2287_v6, %v2204_v14  ;;  %v2375_v21 = vpop.f32.mrf.mxu1 }
 0x422   :  { %v2289_v32 = vpop.f32.mrf.mxu0 }
 0x423   :  { %v2380_v13 = vadd.f32 %v2375_v21, %v2292_v17  ;;  %v2293_v56 = vadd.f32 %v2289_v32, %v2205_v16  ;;  %v2377_v58 = vpop.f32.mrf.mxu1 }
 0x425   :  { %v2381_v18 = vadd.f32 %v2377_v58, %v2293_v56  ;;  %v2463_v22 = vpop.f32.mrf.mxu0  ;;  %v2580_v23 = vpop.f32.mrf.mxu1 }
 0x426   :  { %v5719_v24 = vadd.f32 %v2463_v22, %v2380_v13  ;;  %v3274_v13 = vpop.permute.xlu1 %3273 }
 0x427   :  { %v2465_v28 = vpop.f32.mrf.mxu0  ;;  %v2582_v19 = vpop.f32.mrf.mxu1 }
 0x428   :  { %v5721_v30 = vadd.f32 %v2465_v28, %v2381_v18  ;;  %v3282_v18 = vpop.permute.xlu0 %3281 }
 0x429   :  { %v2654_v33 = vpop.f32.mrf.mxu0 }
 0x42a   :  { %v2655_v29 = vadd.f32 %v2654_v33, %v2580_v23  ;;  %v2739_v48 = vpop.f32.mrf.mxu1 }
 0x42b   :  { %v2656_v25 = vpop.f32.mrf.mxu0 }
 0x42c   :  { %v2744_v31 = vadd.f32 %v2739_v48, %v2655_v29  ;;  %v2657_v50 = vadd.f32 %v2656_v25, %v2582_v19  ;;  %v2741_v37 = vpop.f32.mrf.mxu1 }
 0x42d   :  { %v2826_v43 = vpop.f32.mrf.mxu0 }
 0x42e   :  { %v2745_v62 = vadd.f32 %v2741_v37, %v2657_v50  ;;  %v2831_v4 = vadd.f32 %v2826_v43, %v2744_v31  ;;  %v2913_v0 = vpop.f32.mrf.mxu1 }
 0x42f   :  { %v2828_v7 = vpop.f32.mrf.mxu0 }
 0x430   :  { %v2918_v34 = vadd.f32 %v2913_v0, %v2831_v4  ;;  %v2832_v35 = vadd.f32 %v2828_v7, %v2745_v62  ;;  %v2915_v39 = vpop.f32.mrf.mxu1 }
 0x431   :  { %v3000_v49 = vpop.f32.mrf.mxu0 }
 0x432   :  { %v2919_v59 = vadd.f32 %v2915_v39, %v2832_v35  ;;  %v3005_v8 = vadd.f32 %v3000_v49, %v2918_v34  ;;  %v3087_v10 = vpop.f32.mrf.mxu1 }
 0x433   :  { %v3002_v40 = vpop.f32.mrf.mxu0 }
 0x434   :  { %v3092_v1 = vadd.f32 %v3087_v10, %v3005_v8  ;;  %v3006_v46 = vadd.f32 %v3002_v40, %v2919_v59  ;;  %v3089_v47 = vpop.f32.mrf.mxu1 }
 0x435   :  { %v3174_v55 = vpop.f32.mrf.mxu0 }
 0x436   :  { %v3093_v15 = vadd.f32 %v3089_v47, %v3006_v46  ;;  %v3179_v14 = vadd.f32 %v3174_v55, %v3092_v1 }
 0x437   :  { %v3176_v44 = vpop.f32.mrf.mxu0  ;;  %v3261_v6 = vpop.f32.mrf.mxu1 }
 0x438   :  { %v3180_v16 = vadd.f32 %v3176_v44, %v3093_v15  ;;  %v3266_v17 = vadd.f32 %v3261_v6, %v3179_v14 }
 0x439   :  { %v3263_v21 = vpop.f32.mrf.mxu1 }
 0x43a   :  { %v3268_v32 = vmax.f32 %v3266_v17, 0.0  ;;  %v3267_v58 = vadd.f32 %v3263_v21, %v3180_v16 }
 0x43c   :  { %v3276_v56 = vmul.f32 %v3274_v13, %v3268_v32  ;;  %v3269_v28 = vmax.f32 %v3267_v58, 0.0 }
 0x43e   :  { %v5723_v22 = vadd.f32 %v3282_v18, %v3276_v56  ;;  %v3277_v19 = vmul.f32 %v3274_v13, %v3269_v28 }
 0x440   :  { %v3286_v23 = vsel %vm5256_vm9, %v5723_v22, 0.0  ;;  %v3285_v33 = vadd.f32 %v3282_v18, %v3277_v19 }
 0x441   :  { %3385 = vrot.lane.b32.xlu0 %v3286_v23, %s5080_s7  ;;  %3301 = vrot.lane.b32.xlu1 %v3286_v23, %s5081_s8 }
 0x442   :  { %v3287_v29 = vsel %vm5271_vm12, %v3285_v33, 0.0 }
 0x445   :  { %3557 = vrot.lane.b32.xlu0 %v3286_v23, %s5082_s9  ;;  %3470 = vrot.lane.b32.xlu1 %v3286_v23, %s5083_s10 }
 0x449   :  { %3807 = vrot.lane.b32.xlu0 %v3286_v23, %s5084_s11  ;;  %3720 = vrot.lane.b32.xlu1 %v3286_v23, %s5070_s19 }
 0x44d   :  { %3303 = vrot.lane.b32.xlu0 %v3287_v29, %s5081_s8  ;;  %3387 = vrot.lane.b32.xlu1 %v3287_v29, %s5080_s7 }
 0x451   :  { %3472 = vrot.lane.b32.xlu0 %v3287_v29, %s5083_s10  ;;  %3894 = vrot.lane.b32.xlu1 %v3286_v23, %s5073_s25 }
 0x455   :  { %3898 = vrot.lane.b32.xlu0 %v5910_v52, %s5073_s25  ;;  %3559 = vrot.lane.b32.xlu1 %v3287_v29, %s5082_s9 }
 0x459   :  { %3809 = vrot.lane.b32.xlu0 %v3287_v29, %s5084_s11  ;;  %3722 = vrot.lane.b32.xlu1 %v3287_v29, %s5070_s19 }
 0x45d   :  { %3983 = vrot.lane.b32.xlu0 %v3287_v29, %s5074_s26  ;;  %3896 = vrot.lane.b32.xlu1 %v3287_v29, %s5073_s25 }
 0x461   :  { %3981 = vrot.lane.b32.xlu0 %v3286_v23, %s5074_s26  ;;  %3985 = vrot.lane.b32.xlu1 %v5910_v52, %s5074_s26 }
 0x465   :  { %4080 = vperm.xlu0 %5045, %v5302_v54   ;;  %4072 = vperm.xlu1 %5046, %v5297_v53   ;;  %v3300_v54 = vpop.permute.xlu1 %3299  ;;  %v3384_v53 = vpop.permute.xlu0 %3383 }
 0x469   :  { %4182 = vrot.lane.b32.xlu0 %v5910_v52, %s5080_s7  ;;  %4098 = vrot.lane.b32.xlu1 %v5910_v52, %s5081_s8  ;;  %v3469_v48 = vpop.permute.xlu1 %3468  ;;  %v3556_v25 = vpop.permute.xlu0 %3555 }
 0x46d   :  { %4354 = vrot.lane.b32.xlu0 %v5910_v52, %s5082_s9  ;;  %4267 = vrot.lane.b32.xlu1 %v5910_v52, %s5083_s10  ;;  %v3812_v31 = vpop.permute.xlu1 %3811  ;;  %v3725_v50 = vpop.permute.xlu0 %3724 }
 0x471   :  { %4523 = vrot.lane.b32.xlu0 %v5910_v52, %s5070_s19  ;;  %4610 = vrot.lane.b32.xlu1 %v5910_v52, %s5084_s11 }
 0x4b3   :  { %v3302_v37 = vpop.permute.xlu1 %3301  ;;  %v3386_v43 = vpop.permute.xlu0 %3385 }
 0x4b4   :  { %v3305_v59 = vsel %vm886_vm13, %v3300_v54, %v3302_v37  ;;  %v3389_v8 = vsel %vm971_vm14, %v3384_v53, %v3386_v43 }
 0x4b7   :  { %v3471_v62 = vpop.permute.xlu1 %3470  ;;  %v3558_v4 = vpop.permute.xlu0 %3557 }
 0x4b8   :  { %v3474_v46 = vsel %vm1058_vm15, %v3469_v48, %v3471_v62  ;;  %v3561_v55 = vsel %vm1147_vm10, %v3556_v25, %v3558_v4 }
 0x4bb   :  { %v3721_v0 = vpop.permute.xlu1 %3720  ;;  %v3808_v7 = vpop.permute.xlu0 %3807 }
 0x4bf   :  { %v3388_v34 = vpop.permute.xlu1 %3387  ;;  %v3304_v35 = vpop.permute.xlu0 %3303 }
 0x4c0   :  { %v3306_v39 = vsel %vm886_vm13, %v3302_v37, %v3304_v35  ;;  %v3390_v49 = vsel %vm971_vm14, %v3386_v43, %v3388_v34 }
 0x4c1   :  { %3342 = vmatprep.subr.mxu0 %v3306_v39  ;;  %3426 = vmatprep.subr.mxu1 %v3390_v49 }
 0x4c2   :  { %3343 = vmatpush1.msra.mxu0 %v3305_v59  ;;  %3427 = vmatpush1.msra.mxu1 %v3389_v8 }
 0x4c3   :  { %v3895_v10 = vpop.permute.xlu1 %3894  ;;  %4982 = vmatmul.mubr.msk.f32.vlgmr.msra.gmra.mxu0 %vm75_vm0, %v5327_v11  ;;  %v3473_v40 = vpop.permute.xlu0 %3472  ;;  %4983 = vmatmul.mubr.msk.f32.vlgmr.msra.gmra.mxu1 %vm75_vm0, %v5332_v12 }
 0x4c4   :  { %v3475_v1 = vsel %vm1058_vm15, %v3471_v62, %v3473_v40  ;;  %3545 = vmatprep.mubr.f32.mxu0 %v5910_v52  ;;  %3632 = vmatprep.mubr.f32.mxu1 %v5910_v52 }
 0x4c5   :  { %3511 = vmatprep.subr.mxu0 %v3475_v1 }
 0x4c6   :  { %3512 = vmatpush1.msra.mxu0 %v3474_v46 }
 0x4c7   :  { %v3560_v47 = vpop.permute.xlu1 %3559  ;;  %4985 = vmatmul.mubr.msk.f32.vlgmr.msra.gmra.mxu0 %vm75_vm0, %v5345_v20  ;;  %5024 = vmatprep.subr.msk.mxu0 %vm5271_vm12, %v3285_v33  ;;  %v3899_v11 = vpop.permute.xlu0 %3898 }
 0x4c8   :  { %5025 = vmatpush1.msk.msra.mxu0 %vm5256_vm9, %v5723_v22  ;;  %v3562_v12 = vsel %vm1147_vm10, %v3558_v4, %v3560_v47  ;;  %3709 = vmatprep.mubr.f32.mxu0 %v5910_v52 }
 0x4c9   :  { %3598 = vmatprep.subr.mxu1 %v3562_v12 }
 0x4ca   :  { %3599 = vmatpush1.msra.mxu1 %v3561_v55 }
 0x4cb   :  { %v3723_v15 = vpop.permute.xlu1 %3722  ;;  %4987 = vmatmul.mubr.msk.f32.vlgmr.msra.gmra.mxu1 %vm75_vm0, %v5361_v26  ;;  %v3810_v20 = vpop.permute.xlu0 %3809  ;;  %4989 = vmatmul.mubr.msk.f32.vlgmr.msra.gmra.mxu0 %vm75_vm0, %v5367_v27 }
 0x4cc   :  { %v3726_v14 = vsel %vm70_vm1, %v3721_v0, %v3723_v15  ;;  %v3813_v44 = vsel %vm1403_vm11, %v3808_v7, %v3810_v20  ;;  %v3727_v6 = vsel %vm70_vm1, %v3723_v15, %v3725_v50  ;;  %v3814_v16 = vsel %vm1403_vm11, %v3810_v20, %v3812_v31  ;;  %3797 = vmatprep.mubr.f32.mxu1 %v5910_v52 }
 0x4cd   :  { %3763 = vmatprep.subr.mxu1 %v3727_v6  ;;  %3850 = vmatprep.subr.mxu0 %v3814_v16 }
 0x4ce   :  { %3764 = vmatpush1.msra.mxu1 %v3726_v14  ;;  %3851 = vmatpush1.msra.mxu0 %v3813_v44 }
 0x4cf   :  { %v3897_v17 = vpop.permute.xlu1 %3896  ;;  %4991 = vmatmul.mubr.msk.f32.vlgmr.msra.gmra.mxu1 %vm75_vm0, %v5382_v36  ;;  %v3984_v26 = vpop.permute.xlu0 %3983  ;;  %3884 = vmatprep.mubr.f32.mxu0 %v5910_v52 }
 0x4d0   :  { %v3900_v27 = vsel %vm321_vm3, %v3895_v10, %v3897_v17  ;;  %4993 = vmatmul.mubr.msk.f32.vlgmr.msra.gmra.mxu0 %vm75_vm0, %v5387_v38  ;;  %v3901_v21 = vsel %vm321_vm3, %v3897_v17, %v3899_v11  ;;  %3971 = vmatprep.mubr.f32.mxu1 %v5910_v52  ;;  %v5911_v38 = vld [vmem:[#allocation6_spill] sm:$0xff] }
 0x4d1   :  { %3937 = vmatprep.subr.mxu1 %v3901_v21  ;;  %4058 = vmatprep.mubr.f32.mxu0 %v5910_v52  ;;  %v5018_v21 = vld [vmem:[%s5899_s2 + $0x10] sm:$0xff]  ;;  %s5085_s2 = smov [#allocation3]  }
 0x4d2   :  { %3938 = vmatpush1.msra.mxu1 %v3900_v27 }
 0x4d3   :  { %v3986_v32 = vpop.permute.xlu1 %3985  ;;  %4995 = vmatmul.mubr.msk.f32.vlgmr.msra.gmra.mxu1 %vm75_vm0, %v5400_v45  ;;  %v3982_v36 = vpop.permute.xlu0 %3981 }
 0x4d4   :  { %v3987_v13 = vsel %vm410_vm4, %v3982_v36, %v3984_v26  ;;  %v3988_v56 = vsel %vm410_vm4, %v3984_v26, %v3986_v32  ;;  %4175 = vmatprep.mubr.f32.mxu1 %v5910_v52  ;;  %v5019_v32 = vld [vmem:[%s5900_s3 + $0x10] sm:$0xff]  ;;  %s4892_s3 = sshll.u32 %s5085_s2, 4  ;;  %s4893_s3 = int_to_ptr.vmem [resolvable:$true] %s4892_s3 }
 0x4d5   :  { %4024 = vmatprep.subr.mxu0 %v3988_v56  ;;  %p5053_p1 = scmp.lt.s32.totalorder %s4893_s3, %s4893_s3 }
 0x4d6   :  { %4025 = vmatpush1.msra.mxu0 %v3987_v13 }
 0x4d7   :  { %4997 = vmatmul.mubr.msk.f32.vlgmr.msra.gmra.mxu0 %vm75_vm0, %v5911_v38 }
 0x4d8   :  { %4259 = vmatprep.mubr.f32.mxu0 %v5910_v52 }
 0x4e0   :  { %v4073_v55 = vpop.permute.xlu1 %4072  ;;  %v4081_v14 = vpop.permute.xlu0 %4080 }
 0x4e4   :  { %v4099_v36 = vpop.permute.xlu1 %4098  ;;  %v4183_v13 = vpop.permute.xlu0 %4182 }
 0x4e8   :  { %v4268_v56 = vpop.permute.xlu1 %4267  ;;  %v4355_v38 = vpop.permute.xlu0 %4354 }
 0x583   :  { %v3378_v58 = vpop.f32.mrf.mxu0  ;;  %v3462_v18 = vpop.f32.mrf.mxu1 }
 0x584   :  { %v3463_v22 = vadd.f32 %v3462_v18, %v3378_v58  ;;  %v4611_v58 = vpop.permute.xlu1 %4610  ;;  %v4524_v18 = vpop.permute.xlu0 %4523 }
 0x585   :  { %v3380_v23 = vpop.f32.mrf.mxu0  ;;  %v3464_v28 = vpop.f32.mrf.mxu1 }
 0x586   :  { %v3465_v19 = vadd.f32 %v3464_v28, %v3380_v23 }
 0x587   :  { %v3547_v45 = vpop.f32.mrf.mxu0 }
 0x588   :  { %v3552_v33 = vadd.f32 %v3547_v45, %v3463_v22 }
 0x589   :  { %v3549_v29 = vpop.f32.mrf.mxu0 }
 0x58a   :  { %v3553_v48 = vadd.f32 %v3549_v29, %v3465_v19 }
 0x58b   :  { %v3634_v54 = vpop.f32.mrf.mxu1  ;;  %v3711_v53 = vpop.f32.mrf.mxu0 }
 0x58c   :  { %v3639_v25 = vadd.f32 %v3634_v54, %v3552_v33 }
 0x58d   :  { %v3636_v31 = vpop.f32.mrf.mxu1  ;;  %v3713_v50 = vpop.f32.mrf.mxu0 }
 0x58e   :  { %v3640_v37 = vadd.f32 %v3636_v31, %v3553_v48  ;;  %v3716_v43 = vadd.f32 %v3711_v53, %v3639_v25 }
 0x58f   :  { %v3799_v62 = vpop.f32.mrf.mxu1 }
 0x590   :  { %v3717_v4 = vadd.f32 %v3713_v50, %v3640_v37  ;;  %v3804_v0 = vadd.f32 %v3799_v62, %v3716_v43  ;;  %v3886_v7 = vpop.f32.mrf.mxu0 }
 0x591   :  { %v3801_v34 = vpop.f32.mrf.mxu1 }
 0x592   :  { %v3805_v35 = vadd.f32 %v3801_v34, %v3717_v4  ;;  %v3891_v39 = vadd.f32 %v3886_v7, %v3804_v0  ;;  %v3888_v49 = vpop.f32.mrf.mxu0 }
 0x593   :  { %v3973_v59 = vpop.f32.mrf.mxu1 }
 0x594   :  { %v3892_v8 = vadd.f32 %v3888_v49, %v3805_v35  ;;  %v3978_v10 = vadd.f32 %v3973_v59, %v3891_v39 }
 0x595   :  { %v3975_v40 = vpop.f32.mrf.mxu1 }
 0x596   :  { %v3979_v11 = vadd.f32 %v3975_v40, %v3892_v8  ;;  %v2470_v40 = vmax.f32 %v5719_v24, 0.0 }
 0x597   :  { %v4060_v1 = vpop.f32.mrf.mxu0 }
 0x598   :  { %v4065_v46 = vadd.f32 %v4060_v1, %v3978_v10 }
 0x599   :  { %v4062_v47 = vpop.f32.mrf.mxu0 }
 0x59a   :  { %v4067_v12 = vmax.f32 %v4065_v46, 0.0  ;;  %v4066_v20 = vadd.f32 %v4062_v47, %v3979_v11 }
 0x59c   :  { %v4075_v15 = vmul.f32 %v4073_v55, %v4067_v12  ;;  %v4068_v16 = vmax.f32 %v4066_v20, 0.0 }
 0x59e   :  { %v5812_v44 = vadd.f32 %v4081_v14, %v4075_v15  ;;  %v4076_v17 = vmul.f32 %v4073_v55, %v4068_v16 }
 0x5a0   :  { %v4085_v6 = vsel %vm5256_vm9, %v5812_v44, 0.0  ;;  %v4084_v26 = vadd.f32 %v4081_v14, %v4076_v17 }
 0x5a1   :  { %4184 = vrot.lane.b32.xlu0 %v4085_v6, %s5080_s7  ;;  %4100 = vrot.lane.b32.xlu1 %v4085_v6, %s5081_s8 }
 0x5a2   :  { %v4086_v27 = vsel %vm5271_vm12, %v4084_v26, 0.0 }
 0x5a5   :  { %4356 = vrot.lane.b32.xlu0 %v4085_v6, %s5082_s9  ;;  %4269 = vrot.lane.b32.xlu1 %v4085_v6, %s5083_s10 }
 0x5a9   :  { %4606 = vrot.lane.b32.xlu0 %v4085_v6, %s5084_s11  ;;  %4519 = vrot.lane.b32.xlu1 %v4085_v6, %s5070_s19 }
 0x5ad   :  { %4102 = vrot.lane.b32.xlu0 %v4086_v27, %s5081_s8  ;;  %4186 = vrot.lane.b32.xlu1 %v4086_v27, %s5080_s7 }
 0x5b1   :  { %4271 = vrot.lane.b32.xlu0 %v4086_v27, %s5083_s10  ;;  %4693 = vrot.lane.b32.xlu1 %v4085_v6, %s5073_s25 }
 0x5b5   :  { %4697 = vrot.lane.b32.xlu0 %v5910_v52, %s5073_s25  ;;  %4358 = vrot.lane.b32.xlu1 %v4086_v27, %s5082_s9 }
 0x5b9   :  { %4608 = vrot.lane.b32.xlu0 %v4086_v27, %s5084_s11  ;;  %4521 = vrot.lane.b32.xlu1 %v4086_v27, %s5070_s19  ;;  %s5048_s19 = scalar_lea.vmem %s4893_s3, 512 }
 0x5ba   :  { %p5049_p0 = scmp.ne.s32.totalorder %s4893_s3, %s5048_s19  ;;  %p5054_p2 = scmp.lt.s32.totalorder %s5048_s19, %s5048_s19 }
 0x5bc   :  { %p5055_p3 = por %p5054_p2, %p5053_p1 }
 0x5bd   :  { %4782 = vrot.lane.b32.xlu0 %v4086_v27, %s5074_s26  ;;  %4695 = vrot.lane.b32.xlu1 %v4086_v27, %s5073_s25 }
 0x5be   :  { %p5056_p4 = pnand %p5055_p3, %p5049_p0 }
 0x5c1   :  { %4780 = vrot.lane.b32.xlu0 %v4085_v6, %s5074_s26  ;;  %4784 = vrot.lane.b32.xlu1 %v5910_v52, %s5074_s26 }
 0x5c5   :  { %4871 = vperm.xlu0 %5045, %v5018_v21   ;;  %2476 = vperm.xlu1 %5046, %v5018_v21  }
 0x5c9   :  { %4879 = vperm.xlu0 %5045, %v5019_v32   ;;  %2485 = vperm.xlu1 %5046, %v5019_v32  }
 0x613   :  { %v4101_v22 = vpop.permute.xlu1 %4100  ;;  %v4185_v23 = vpop.permute.xlu0 %4184 }
 0x614   :  { %v4104_v25 = vsel %vm886_vm13, %v4099_v36, %v4101_v22  ;;  %v4188_v31 = vsel %vm971_vm14, %v4183_v13, %v4185_v23 }
 0x617   :  { %v4270_v28 = vpop.permute.xlu1 %4269  ;;  %v4357_v45 = vpop.permute.xlu0 %4356 }
 0x618   :  { %v4273_v62 = vsel %vm1058_vm15, %v4268_v56, %v4270_v28 }
 0x61b   :  { %v4520_v19 = vpop.permute.xlu1 %4519  ;;  %v4607_v33 = vpop.permute.xlu0 %4606 }
 0x61f   :  { %v4187_v29 = vpop.permute.xlu1 %4186  ;;  %v4103_v54 = vpop.permute.xlu0 %4102 }
 0x620   :  { %v4105_v53 = vsel %vm886_vm13, %v4101_v22, %v4103_v54  ;;  %v4189_v48 = vsel %vm971_vm14, %v4185_v23, %v4187_v29 }
 0x621   :  { %4141 = vmatprep.subr.mxu1 %v4105_v53  ;;  %4225 = vmatprep.subr.mxu0 %v4189_v48 }
 0x622   :  { %4142 = vmatpush1.msra.mxu1 %v4104_v25  ;;  %4226 = vmatpush1.msra.mxu0 %v4188_v31 }
 0x623   :  { %v4694_v50 = vpop.permute.xlu1 %4693  ;;  %v4272_v37 = vpop.permute.xlu0 %4271  ;;  %5002 = vmatmul.mubr.msk.f32.vlgmr.msra.gmra.mxu1 %vm75_vm0, %v5558_v60  ;;  %5003 = vmatmul.mubr.msk.f32.vlgmr.msra.gmra.mxu0 %vm75_vm0, %v5563_v61  ;;  %v4360_v61 = vsel %vm1147_vm10, %v4355_v38, %v4357_v45 }
 0x624   :  { %v4274_v43 = vsel %vm1058_vm15, %v4270_v28, %v4272_v37  ;;  %4344 = vmatprep.mubr.f32.mxu1 %v5910_v52  ;;  %4431 = vmatprep.mubr.f32.mxu0 %v5910_v52 }
 0x625   :  { %4310 = vmatprep.subr.mxu1 %v4274_v43 }
 0x626   :  { %4311 = vmatpush1.msra.mxu1 %v4273_v62 }
 0x627   :  { %v4359_v4 = vpop.permute.xlu1 %4358  ;;  %5026 = vmatprep.subr.msk.mxu1 %vm5271_vm12, %v4084_v26  ;;  %v4698_v0 = vpop.permute.xlu0 %4697  ;;  %5005 = vmatmul.mubr.msk.f32.vlgmr.msra.gmra.mxu1 %vm75_vm0, %v5578_v2 }
 0x628   :  { %5027 = vmatpush1.msk.msra.mxu1 %vm5256_vm9, %v5812_v44  ;;  %v4361_v60 = vsel %vm1147_vm10, %v4357_v45, %v4359_v4  ;;  %4508 = vmatprep.mubr.f32.mxu1 %v5910_v52 }
 0x629   :  { %4397 = vmatprep.subr.mxu0 %v4361_v60 }
 0x62a   :  { %4398 = vmatpush1.msra.mxu0 %v4360_v61 }
 0x62b   :  { %v4522_v7 = vpop.permute.xlu1 %4521  ;;  %v4609_v34 = vpop.permute.xlu0 %4608  ;;  %5007 = vmatmul.mubr.msk.f32.vlgmr.msra.gmra.mxu0 %vm75_vm0, %v5583_v5  ;;  %5009 = vmatmul.mubr.msk.f32.vlgmr.msra.gmra.mxu1 %vm75_vm0, %v5602_v3 }
 0x62c   :  { %v4525_v51 = vsel %vm70_vm1, %v4520_v19, %v4522_v7  ;;  %v4612_v41 = vsel %vm1403_vm11, %v4607_v33, %v4609_v34  ;;  %v4526_v2 = vsel %vm70_vm1, %v4522_v7, %v4524_v18  ;;  %v4613_v35 = vsel %vm1403_vm11, %v4609_v34, %v4611_v58  ;;  %4596 = vmatprep.mubr.f32.mxu0 %v5910_v52 }
 0x62d   :  { %4562 = vmatprep.subr.mxu0 %v4526_v2  ;;  %4649 = vmatprep.subr.mxu1 %v4613_v35 }
 0x62e   :  { %4563 = vmatpush1.msra.mxu0 %v4525_v51  ;;  %4650 = vmatpush1.msra.mxu1 %v4612_v41 }
 0x62f   :  { %v4696_v39 = vpop.permute.xlu1 %4695  ;;  %v4783_v49 = vpop.permute.xlu0 %4782  ;;  %5011 = vmatmul.mubr.msk.f32.vlgmr.msra.gmra.mxu0 %vm75_vm0, %v5607_v57  ;;  %4683 = vmatprep.mubr.f32.mxu1 %v5910_v52 }
 0x630   :  { %v4699_v5 = vsel %vm321_vm3, %v4694_v50, %v4696_v39  ;;  %v4700_v3 = vsel %vm321_vm3, %v4696_v39, %v4698_v0  ;;  %5013 = vmatmul.mubr.msk.f32.vlgmr.msra.gmra.mxu1 %vm75_vm0, %v5627_v63  ;;  %4770 = vmatprep.mubr.f32.mxu0 %v5910_v52 }
 0x631   :  { %4736 = vmatprep.subr.mxu0 %v4700_v3  ;;  %4857 = vmatprep.mubr.f32.mxu1 %v5910_v52  ;;  %v2471_v52 = vmax.f32 %v5721_v30, 0.0 }
 0x632   :  { %4737 = vmatpush1.msra.mxu0 %v4699_v5 }
 0x633   :  { %v4785_v59 = vpop.permute.xlu1 %4784  ;;  %v4781_v8 = vpop.permute.xlu0 %4780  ;;  %5015 = vmatmul.mubr.msk.f32.vlgmr.msra.gmra.mxu0 %vm75_vm0, %v5632_v42 }
 0x634   :  { %v4786_v57 = vsel %vm410_vm4, %v4781_v8, %v4783_v49  ;;  %v4787_v10 = vsel %vm410_vm4, %v4783_v49, %v4785_v59 }
 0x635   :  { %4823 = vmatprep.subr.mxu1 %v4787_v10 }
 0x636   :  { %4824 = vmatpush1.msra.mxu1 %v4786_v57 }
 0x637   :  { %5017 = vmatmul.mubr.msk.f32.vlgmr.msra.gmra.mxu1 %vm75_vm0, %v5655_v9 }
 0x640   :  { %v2477_v63 = vpop.permute.xlu1 %2476  ;;  %v4872_v54 = vpop.permute.xlu0 %4871 }
 0x641   :  { %v2479_v1 = vmul.f32 %v2477_v63, %v2470_v40  ;;  %v2480_v46 = vmul.f32 %v2477_v63, %v2471_v52 }
 0x644   :  { %v2486_v47 = vpop.permute.xlu1 %2485  ;;  %v4880_v4 = vpop.permute.xlu0 %4879 }
 0x645   :  { %v2488_v11 = vadd.f32 %v2486_v47, %v2479_v1  ;;  %v2489_v12 = vadd.f32 %v2486_v47, %v2480_v46 }
 0x647   :  { %2490 = vst [vmem:[#allocation3] sm:$0xff] %v2488_v11  ;;  %2491 = vst [vmem:[#allocation3 + $0x8] sm:$0xff] %v2489_v12 }
 0x6e3   :  { %v4177_v42 = vpop.f32.mrf.mxu1  ;;  %v4261_v55 = vpop.f32.mrf.mxu0 }
 0x6e4   :  { %v4262_v15 = vadd.f32 %v4261_v55, %v4177_v42 }
 0x6e5   :  { %v4179_v20 = vpop.f32.mrf.mxu1  ;;  %v4263_v14 = vpop.f32.mrf.mxu0 }
 0x6e6   :  { %v4264_v6 = vadd.f32 %v4263_v14, %v4179_v20 }
 0x6e7   :  { %v4346_v44 = vpop.f32.mrf.mxu1 }
 0x6e8   :  { %v4351_v9 = vadd.f32 %v4346_v44, %v4262_v15 }
 0x6e9   :  { %v4348_v16 = vpop.f32.mrf.mxu1 }
 0x6ea   :  { %v4352_v26 = vadd.f32 %v4348_v16, %v4264_v6 }
 0x6eb   :  { %v4433_v17 = vpop.f32.mrf.mxu0  ;;  %v4510_v24 = vpop.f32.mrf.mxu1 }
 0x6ec   :  { %v4438_v30 = vadd.f32 %v4433_v17, %v4351_v9 }
 0x6ed   :  { %v4435_v27 = vpop.f32.mrf.mxu0  ;;  %v4512_v21 = vpop.f32.mrf.mxu1 }
 0x6ee   :  { %v4439_v32 = vadd.f32 %v4435_v27, %v4352_v26  ;;  %v4515_v36 = vadd.f32 %v4510_v24, %v4438_v30 }
 0x6ef   :  { %v4598_v13 = vpop.f32.mrf.mxu0 }
 0x6f0   :  { %v4516_v56 = vadd.f32 %v4512_v21, %v4439_v32  ;;  %v4603_v38 = vadd.f32 %v4598_v13, %v4515_v36  ;;  %v4685_v58 = vpop.f32.mrf.mxu1 }
 0x6f1   :  { %v4600_v18 = vpop.f32.mrf.mxu0 }
 0x6f2   :  { %v4604_v22 = vadd.f32 %v4600_v18, %v4516_v56  ;;  %v4690_v23 = vadd.f32 %v4685_v58, %v4603_v38  ;;  %v4687_v28 = vpop.f32.mrf.mxu1 }
 0x6f3   :  { %v4772_v45 = vpop.f32.mrf.mxu0 }
 0x6f4   :  { %v4691_v19 = vadd.f32 %v4687_v28, %v4604_v22  ;;  %v4777_v29 = vadd.f32 %v4772_v45, %v4690_v23 }
 0x6f5   :  { %v4774_v33 = vpop.f32.mrf.mxu0 }
 0x6f6   :  { %v4778_v48 = vadd.f32 %v4774_v33, %v4691_v19 }
 0x6f7   :  { %v4859_v53 = vpop.f32.mrf.mxu1 }
 0x6f8   :  { %v4864_v25 = vadd.f32 %v4859_v53, %v4777_v29 }
 0x6f9   :  { %v4861_v31 = vpop.f32.mrf.mxu1 }
 0x6fa   :  { %v4866_v50 = vmax.f32 %v4864_v25, 0.0  ;;  %v4865_v37 = vadd.f32 %v4861_v31, %v4778_v48 }
 0x6fc   :  { %v4874_v43 = vmul.f32 %v4872_v54, %v4866_v50  ;;  %v4867_v62 = vmax.f32 %v4865_v37, 0.0 }
 0x6fe   :  { %v4882_v0 = vadd.f32 %v4880_v4, %v4874_v43  ;;  %v4875_v60 = vmul.f32 %v4872_v54, %v4867_v62 }
 0x700   :  { %4885 = vst [vmem:[#allocation3 + $0x10] sm:$0xff] %v4882_v0  ;;  %v4883_v61 = vadd.f32 %v4880_v4, %v4875_v60 }
 0x702   :  { %4886 = vst [vmem:[#allocation3 + $0x18] sm:$0xff] %v4883_v61 }
 0x703   :  { %5059 = shalt.err (!%p5056_p4)
}
 0x704   :  { %s5086_s25 = smov 256  }
 0x705   :  { %4898 = dma.vmem_to_hbm [thread:$0]  %s4893_s3, 512, %s5901_s4, [#allocation4], %s5086_s25, %s5086_s25, %s5081_s8  }
 0x706   :  { %5068 = dma.done.wait [#allocation4], 512  }
 0x707   :  { %5069 = vsyncadd [#allocation4], 4294966784 }
 0x708   :  { %4902 = vsyncpa [#allocation4], 1 }

</bundles_post_ra>
